<compile_context>
chip_gen: v7x
topology: tpu7x:2x2x1
jax: 0.10.0
libtpu: 0.0.40
codegen_flags: <defaults>
</compile_context>

<pallas_src>
import math

import jax
import jax.numpy as jnp
from jax import lax
from jax.experimental import pallas as pl
from jax.experimental.pallas import tpu as pltpu

# ----------------------------- model config --------------------------------
VOCAB = 128
HIDDEN = 32
N_LAYERS = 2
N_HEADS = 4
HEAD_DIM = HIDDEN // N_HEADS
INTERMEDIATE = 64
MAX_POS = 64
LN_EPS = 1e-12


# --------------------------- in-kernel helpers ------------------------------
def _gelu(x):
    # exact (erf-based) GELU, as used by bert-base-chinese
    return 0.5 * x * (1.0 + lax.erf(x * (1.0 / math.sqrt(2.0))))


def _layernorm(x, g, b):
    mu = jnp.mean(x, axis=-1, keepdims=True)
    var = jnp.mean(jnp.square(x - mu), axis=-1, keepdims=True)
    return (x - mu) * lax.rsqrt(var + LN_EPS) * g + b


def _dot_bf16(x, w_bf16, bias=None):
    """bf16 MXU matmul with f32 accumulation; bias add stays in f32."""
    y = jnp.dot(x.astype(jnp.bfloat16), w_bf16, preferred_element_type=jnp.float32)
    if bias is not None:
        y = y + bias
    return y


# --------------------------- fused forward kernel ---------------------------
def _bert_fused_kernel(
    emb_ref, mask_ref,
    emb_g_ref, emb_b_ref,
    wqkv_ref, bqkv_ref, wo_ref, bo_ref,
    ln1g_ref, ln1b_ref,
    w1_ref, b1_ref, w2_ref, b2_ref,
    ln2g_ref, ln2b_ref,
    hwt_ref, hbt_ref, hlng_ref, hlnb_ref,
    wemb_ref, decb_ref,
    logits_ref,
):
    """One grid step = one batch row: embeddings-LN -> layers -> MLM head."""
    scale = 1.0 / math.sqrt(HEAD_DIM)

    x = emb_ref[0]                                         # (S, H) f32
    x = _layernorm(x, emb_g_ref[...], emb_b_ref[...])      # embedding LayerNorm
    add_mask = mask_ref[0]                                 # (1, S) additive mask

    for l in range(N_LAYERS):                              # static unroll
        # ---- fused QKV projection ----
        qkv = _dot_bf16(x, wqkv_ref[l], bqkv_ref[l])       # (S, 3H)
        q = qkv[:, :HIDDEN]
        k = qkv[:, HIDDEN:2 * HIDDEN]
        v = qkv[:, 2 * HIDDEN:]

        # ---- multi-head self attention (heads handled in-kernel) ----
        ctx_heads = []
        for h in range(N_HEADS):                           # static unroll
            sl = slice(h * HEAD_DIM, (h + 1) * HEAD_DIM)
            qh, kh, vh = q[:, sl], k[:, sl], v[:, sl]      # (S, dh) each
            s = lax.dot_general(qh, kh, (((1,), (1,)), ((), ())),
                                preferred_element_type=jnp.float32)  # q @ k^T
            s = s * scale + add_mask
            s = s - jnp.max(s, axis=-1, keepdims=True)
            p = jnp.exp(s)
            p = p / jnp.sum(p, axis=-1, keepdims=True)
            ctx_heads.append(
                jnp.dot(p, vh, preferred_element_type=jnp.float32))
        ctx = jnp.concatenate(ctx_heads, axis=-1)          # (S, H)

        # ---- attention output projection + residual + LN1 ----
        attn_out = _dot_bf16(ctx, wo_ref[l], bo_ref[l])
        x = _layernorm(attn_out + x, ln1g_ref[l], ln1b_ref[l])

        # ---- feed-forward + residual + LN2 ----
        ffn = _gelu(_dot_bf16(x, w1_ref[l], b1_ref[l]))
        ffn = _dot_bf16(ffn, w2_ref[l], b2_ref[l])
        x = _layernorm(ffn + x, ln2g_ref[l], ln2b_ref[l])

    # ---- MLM head: dense + gelu -> LN -> tied decoder ----
    h = _gelu(_dot_bf16(x, hwt_ref[...], hbt_ref[...]))
    h = _layernorm(h, hlng_ref[...], hlnb_ref[...])
    # tied decoder: contract the hidden axis of word_emb (V, H) directly,
    # avoiding any transposed copy of the embedding table.
    logits = lax.dot_general(h.astype(jnp.bfloat16), wemb_ref[...],
                             (((1,), (1,)), ((), ())),
                             preferred_element_type=jnp.float32)
    logits_ref[0] = logits + decb_ref[...]


def _full_spec(arr):
    """Whole-array block, constant block index (no re-DMA across grid steps)."""
    zeros = (0,) * arr.ndim
    return pl.BlockSpec(arr.shape, lambda b: zeros)


def _bert_encoder_logits(params, emb, add_mask):
    """emb: (B, S, H) f32; add_mask: (B, 1, S) additive. Returns (B, S, V)."""
    B, S, _ = emb.shape
    wemb_bf16 = params["word_emb"].astype(jnp.bfloat16)
    args = (
        emb, add_mask,
        params["emb_ln_g"], params["emb_ln_b"],
        params["wqkv"], params["bqkv"], params["wo"], params["bo"],
        params["ln1_g"], params["ln1_b"],
        params["w1"], params["b1"], params["w2"], params["b2"],
        params["ln2_g"], params["ln2_b"],
        params["head_wt"], params["head_bt"],
        params["head_ln_g"], params["head_ln_b"],
        wemb_bf16, params["decoder_b"],
    )
    in_specs = [
        pl.BlockSpec((1, S, HIDDEN), lambda b: (b, 0, 0)),   # embeddings
        pl.BlockSpec((1, 1, S), lambda b: (b, 0, 0)),        # additive mask
    ] + [_full_spec(a) for a in args[2:]]                    # all weights

    return pl.pallas_call(
        _bert_fused_kernel,
        out_shape=jax.ShapeDtypeStruct((B, S, VOCAB), jnp.float32),
        grid=(B,),
        in_specs=in_specs,
        out_specs=pl.BlockSpec((1, S, VOCAB), lambda b: (b, 0, 0)),
        compiler_params=pltpu.CompilerParams(
            dimension_semantics=("parallel",)),
    )(*args)


# --------------------------- masked-LM loss kernel ---------------------------
def _ce_kernel(labels_ref, logits_ref, num_ref, den_ref):
    logits = logits_ref[...]                      # (M, V) f32
    labels = labels_ref[...]                      # (M, 1) int32
    m = jnp.max(logits, axis=-1, keepdims=True)
    lse = jnp.log(jnp.sum(jnp.exp(logits - m), axis=-1, keepdims=True)) + m
    iota = lax.broadcasted_iota(jnp.int32, logits.shape, 1)
    onehot = (iota == labels).astype(jnp.float32)
    picked = jnp.sum(logits * onehot, axis=-1, keepdims=True)
    valid = (labels != -100).astype(jnp.float32)
    per_tok = (lse - picked) * valid
    num_ref[...] = jnp.sum(per_tok).reshape(1, 1)
    den_ref[...] = jnp.sum(valid).reshape(1, 1)


def masked_lm_loss(logits2d, labels2d):
    """CrossEntropyLoss(ignore_index=-100) over flattened tokens."""
    M, V = logits2d.shape
    num, den = pl.pallas_call(
        _ce_kernel,
        out_shape=(
            jax.ShapeDtypeStruct((1, 1), jnp.float32),
            jax.ShapeDtypeStruct((1, 1), jnp.float32),
        ),
        grid=(1,),
        in_specs=[
            pl.BlockSpec((M, 1), lambda i: (0, 0)),
            pl.BlockSpec((M, V), lambda i: (0, 0)),
        ],
        out_specs=(
            pl.BlockSpec((1, 1), lambda i: (0, 0)),
            pl.BlockSpec((1, 1), lambda i: (0, 0)),
        ),
    )(labels2d, logits2d)
    return (num / jnp.maximum(den, 1.0))[0, 0]


# ------------------------------ parameters ----------------------------------
def init_params(key):
    """Deterministic synthetic weights, pre-packed for the fused kernel:
       QKV concatenated, per-layer tensors stacked on a leading layer axis,
       matmul weights stored in bf16 (MXU-native), LN/bias params in f32."""
    std = 0.02
    keys = iter(jax.random.split(key, 16))

    def norm(shape):
        return (std * jax.random.normal(next(keys), shape)).astype(jnp.float32)

    return {
        "word_emb": norm((VOCAB, HIDDEN)),                      # tied decoder
        "pos_emb": norm((MAX_POS, HIDDEN)),
        "type_emb": norm((2, HIDDEN)),
        "emb_ln_g": jnp.ones((1, HIDDEN), jnp.float32),
        "emb_ln_b": jnp.zeros((1, HIDDEN), jnp.float32),
        "wqkv": norm((N_LAYERS, HIDDEN, 3 * HIDDEN)).astype(jnp.bfloat16),
        "bqkv": jnp.zeros((N_LAYERS, 1, 3 * HIDDEN), jnp.float32),
        "wo": norm((N_LAYERS, HIDDEN, HIDDEN)).astype(jnp.bfloat16),
        "bo": jnp.zeros((N_LAYERS, 1, HIDDEN), jnp.float32),
        "ln1_g": jnp.ones((N_LAYERS, 1, HIDDEN), jnp.float32),
        "ln1_b": jnp.zeros((N_LAYERS, 1, HIDDEN), jnp.float32),
        "w1": norm((N_LAYERS, HIDDEN, INTERMEDIATE)).astype(jnp.bfloat16),
        "b1": jnp.zeros((N_LAYERS, 1, INTERMEDIATE), jnp.float32),
        "w2": norm((N_LAYERS, INTERMEDIATE, HIDDEN)).astype(jnp.bfloat16),
        "b2": jnp.zeros((N_LAYERS, 1, HIDDEN), jnp.float32),
        "ln2_g": jnp.ones((N_LAYERS, 1, HIDDEN), jnp.float32),
        "ln2_b": jnp.zeros((N_LAYERS, 1, HIDDEN), jnp.float32),
        "head_wt": norm((HIDDEN, HIDDEN)).astype(jnp.bfloat16),
        "head_bt": jnp.zeros((1, HIDDEN), jnp.float32),
        "head_ln_g": jnp.ones((1, HIDDEN), jnp.float32),
        "head_ln_b": jnp.zeros((1, HIDDEN), jnp.float32),
        "decoder_b": jnp.zeros((1, VOCAB), jnp.float32),
    }


# ------------------------------- forward -------------------------------------
def bert_mlm_forward(params, input_ids, attention_mask=None, labels=None):
    B, S = input_ids.shape
    if attention_mask is None:
        attention_mask = jnp.ones((B, S), jnp.float32)

    # embedding gathers are XLA glue (tiny); the summed embedding feeds the
    # fused kernel directly (embedding LayerNorm happens in-kernel).
    emb = (params["word_emb"][input_ids]
           + params["pos_emb"][:S][None, :, :]
           + params["type_emb"][0][None, None, :]).astype(jnp.float32)
    add_mask = ((1.0 - attention_mask.astype(jnp.float32)) * -10000.0
                ).reshape(B, 1, S)

    logits = _bert_encoder_logits(params, emb, add_mask)     # (B, S, V)

    if labels is None:
        return (logits,)
    loss = masked_lm_loss(logits.reshape(B * S, VOCAB),
                          labels.reshape(B * S, 1).astype(jnp.int32))
    return (loss, logits)   # mirrors HF return_dict=False with labels


# TODO(synk): BertTokenizer / pretrained-checkpoint loading has no Pallas
# equivalent; this script uses deterministic synthetic weights instead.

# --------------------------------- main ---------------------------------------
if __name__ == "__main__":
    B, S = 2, 8
    key = jax.random.PRNGKey(0)
    k_param, k_ids = jax.random.split(key)

    params = init_params(k_param)
    input_ids = jax.random.randint(k_ids, (B, S), 0, VOCAB, dtype=jnp.int32)
    attention_mask = jnp.ones((B, S), jnp.float32)
    labels = input_ids.at[:, -1].set(-100)   # last token ignored (ignore_index=-100)

    fwd = jax.jit(bert_mlm_forward)
    loss, logits = fwd(params, input_ids, attention_mask, labels)
    jax.block_until_ready((loss, logits))

    assert logits.shape == (B, S, VOCAB) and loss.shape == ()
    print("KERNEL_OK")
</pallas_src>

<mosaic_0001>
module attributes {stable_mosaic.version = 11 : i64} {
  func.func @_ce_kernel(%arg0: i32, %arg1: memref<16x1xi32, #tpu.memory_space<vmem>>, %arg2: memref<16x128xf32, #tpu.memory_space<vmem>>, %arg3: memref<1x1xf32, #tpu.memory_space<vmem>>, %arg4: memref<1x1xf32, #tpu.memory_space<vmem>>) attributes {dimension_semantics = [#tpu.dimension_semantics<arbitrary>], iteration_bounds = array<i64: 1>, scalar_prefetch = 0 : i64, scratch_operands = 0 : i64, tpu.core_type = #tpu.core_type<tc>, window_params = [{pipeline_mode = #tpu.pipeline_mode<synchronous>, transform_indices = @transform_0, window_bounds = array<i64: 16, 1>}, {pipeline_mode = #tpu.pipeline_mode<synchronous>, transform_indices = @transform_1, window_bounds = array<i64: 16, 128>}, {pipeline_mode = #tpu.pipeline_mode<synchronous>, transform_indices = @transform_2, window_bounds = array<i64: 1, 1>}, {pipeline_mode = #tpu.pipeline_mode<synchronous>, transform_indices = @transform_3, window_bounds = array<i64: 1, 1>}]} {
    %c0 = arith.constant 0 : index
    %c0_0 = arith.constant 0 : index
    %0 = vector.load %arg2[%c0, %c0_0] : memref<16x128xf32, #tpu.memory_space<vmem>>, vector<16x128xf32>
    %c0_1 = arith.constant 0 : index
    %c0_2 = arith.constant 0 : index
    %1 = vector.load %arg1[%c0_1, %c0_2] : memref<16x1xi32, #tpu.memory_space<vmem>>, vector<16x1xi32>
    %cst = arith.constant dense<0xFF800000> : vector<16xf32>
    %2 = vector.multi_reduction <maximumf>, %0, %cst [1] : vector<16x128xf32> to vector<16xf32>
    %3 = vector.shape_cast %2 : vector<16xf32> to vector<16x1xf32>
    %4 = vector.broadcast %3 : vector<16x1xf32> to vector<16x128xf32>
    %5 = arith.subf %0, %4 : vector<16x128xf32>
    %6 = math.exp %5 : vector<16x128xf32>
    %cst_3 = arith.constant dense<0.000000e+00> : vector<16xf32>
    %7 = vector.multi_reduction <add>, %6, %cst_3 [1] : vector<16x128xf32> to vector<16xf32>
    %8 = vector.shape_cast %7 : vector<16xf32> to vector<16x1xf32>
    %9 = math.log %8 : vector<16x1xf32>
    %10 = arith.addf %9, %3 : vector<16x1xf32>
    %11 = tpu.iota {dimensions = array<i32: 1>} : vector<16x128xi32>
    %12 = vector.broadcast %1 : vector<16x1xi32> to vector<16x128xi32>
    %13 = arith.cmpi eq, %11, %12 : vector<16x128xi32>
    %14 = arith.extui %13 : vector<16x128xi1> to vector<16x128xi32>
    %15 = arith.sitofp %14 : vector<16x128xi32> to vector<16x128xf32>
    %16 = arith.mulf %0, %15 : vector<16x128xf32>
    %cst_4 = arith.constant dense<0.000000e+00> : vector<16xf32>
    %17 = vector.multi_reduction <add>, %16, %cst_4 [1] : vector<16x128xf32> to vector<16xf32>
    %18 = vector.shape_cast %17 : vector<16xf32> to vector<16x1xf32>
    %c-100_i32 = arith.constant -100 : i32
    %19 = vector.broadcast %c-100_i32 : i32 to vector<16x1xi32>
    %20 = arith.cmpi ne, %1, %19 : vector<16x1xi32>
    %21 = arith.extui %20 : vector<16x1xi1> to vector<16x1xi32>
    %22 = arith.sitofp %21 : vector<16x1xi32> to vector<16x1xf32>
    %23 = arith.subf %10, %18 : vector<16x1xf32>
    %24 = arith.mulf %23, %22 : vector<16x1xf32>
    %25 = vector.shape_cast %24 : vector<16x1xf32> to vector<1x16x1xf32>
    %cst_5 = arith.constant dense<0.000000e+00> : vector<1xf32>
    %26 = vector.multi_reduction <add>, %25, %cst_5 [1, 2] : vector<1x16x1xf32> to vector<1xf32>
    %27 = vector.shape_cast %26 : vector<1xf32> to vector<1x1x1xf32>
    %28 = vector.extract %27[0, 0, 0] : f32 from vector<1x1x1xf32>
    %29 = vector.broadcast %28 : f32 to vector<1x1xf32>
    %c0_6 = arith.constant 0 : index
    %c0_7 = arith.constant 0 : index
    %30 = vector.load %arg3[%c0_6, %c0_7] : memref<1x1xf32, #tpu.memory_space<vmem>>, vector<1x1xf32>
    tpu.vector_store %arg3[%c0_6, %c0_7], %29 {strides = array<i32>} : memref<1x1xf32, #tpu.memory_space<vmem>>, vector<1x1xf32>,
    %31 = vector.shape_cast %22 : vector<16x1xf32> to vector<1x16x1xf32>
    %cst_8 = arith.constant dense<0.000000e+00> : vector<1xf32>
    %32 = vector.multi_reduction <add>, %31, %cst_8 [1, 2] : vector<1x16x1xf32> to vector<1xf32>
    %33 = vector.shape_cast %32 : vector<1xf32> to vector<1x1x1xf32>
    %34 = vector.extract %33[0, 0, 0] : f32 from vector<1x1x1xf32>
    %35 = vector.broadcast %34 : f32 to vector<1x1xf32>
    %c0_9 = arith.constant 0 : index
    %c0_10 = arith.constant 0 : index
    %36 = vector.load %arg4[%c0_9, %c0_10] : memref<1x1xf32, #tpu.memory_space<vmem>>, vector<1x1xf32>
    tpu.vector_store %arg4[%c0_9, %c0_10], %35 {strides = array<i32>} : memref<1x1xf32, #tpu.memory_space<vmem>>, vector<1x1xf32>,
    return
  }
  func.func @transform_0(%arg0: i32) -> (i32, i32) {
    %c0_i32 = arith.constant 0 : i32
    %c0_i32_0 = arith.constant 0 : i32
    %c0_i32_1 = arith.constant 0 : i32
    return %c0_i32, %c0_i32_0 : i32, i32
  }
  func.func @transform_1(%arg0: i32) -> (i32, i32) {
    %c0_i32 = arith.constant 0 : i32
    %c0_i32_0 = arith.constant 0 : i32
    %c0_i32_1 = arith.constant 0 : i32
    return %c0_i32, %c0_i32_0 : i32, i32
  }
  func.func @transform_2(%arg0: i32) -> (i32, i32) {
    %c0_i32 = arith.constant 0 : i32
    %c0_i32_0 = arith.constant 0 : i32
    %c0_i32_1 = arith.constant 0 : i32
    return %c0_i32, %c0_i32_0 : i32, i32
  }
  func.func @transform_3(%arg0: i32) -> (i32, i32) {
    %c0_i32 = arith.constant 0 : i32
    %c0_i32_0 = arith.constant 0 : i32
    %c0_i32_1 = arith.constant 0 : i32
    return %c0_i32, %c0_i32_0 : i32, i32
  }
}

module attributes {stable_mosaic.version = 11 : i64} {
  func.func @_bert_fused_kernel(%arg0: i32, %arg1: memref<1x8x32xf32, #tpu.memory_space<vmem>>, %arg2: memref<1x1x8xf32, #tpu.memory_space<vmem>>, %arg3: memref<1x32xf32, #tpu.memory_space<vmem>>, %arg4: memref<1x32xf32, #tpu.memory_space<vmem>>, %arg5: memref<2x32x96xbf16, #tpu.memory_space<vmem>>, %arg6: memref<2x1x96xf32, #tpu.memory_space<vmem>>, %arg7: memref<2x32x32xbf16, #tpu.memory_space<vmem>>, %arg8: memref<2x1x32xf32, #tpu.memory_space<vmem>>, %arg9: memref<2x1x32xf32, #tpu.memory_space<vmem>>, %arg10: memref<2x1x32xf32, #tpu.memory_space<vmem>>, %arg11: memref<2x32x64xbf16, #tpu.memory_space<vmem>>, %arg12: memref<2x1x64xf32, #tpu.memory_space<vmem>>, %arg13: memref<2x64x32xbf16, #tpu.memory_space<vmem>>, %arg14: memref<2x1x32xf32, #tpu.memory_space<vmem>>, %arg15: memref<2x1x32xf32, #tpu.memory_space<vmem>>, %arg16: memref<2x1x32xf32, #tpu.memory_space<vmem>>, %arg17: memref<32x32xbf16, #tpu.memory_space<vmem>>, %arg18: memref<1x32xf32, #tpu.memory_space<vmem>>, %arg19: memref<1x32xf32, #tpu.memory_space<vmem>>, %arg20: memref<1x32xf32, #tpu.memory_space<vmem>>, %arg21: memref<128x32xbf16, #tpu.memory_space<vmem>>, %arg22: memref<1x128xf32, #tpu.memory_space<vmem>>, %arg23: memref<1x8x128xf32, #tpu.memory_space<vmem>>) attributes {dimension_semantics = [#tpu.dimension_semantics<parallel>], iteration_bounds = array<i64: 2>, scalar_prefetch = 0 : i64, scratch_operands = 0 : i64, tpu.core_type = #tpu.core_type<tc>, window_params = [{transform_indices = @transform_0, window_bounds = array<i64: 1, 8, 32>}, {transform_indices = @transform_1, window_bounds = array<i64: 1, 1, 8>}, {pipeline_mode = #tpu.pipeline_mode<synchronous>, transform_indices = @transform_2, window_bounds = array<i64: 1, 32>}, {pipeline_mode = #tpu.pipeline_mode<synchronous>, transform_indices = @transform_3, window_bounds = array<i64: 1, 32>}, {pipeline_mode = #tpu.pipeline_mode<synchronous>, transform_indices = @transform_4, window_bounds = array<i64: 2, 32, 96>}, {pipeline_mode = #tpu.pipeline_mode<synchronous>, transform_indices = @transform_5, window_bounds = array<i64: 2, 1, 96>}, {pipeline_mode = #tpu.pipeline_mode<synchronous>, transform_indices = @transform_6, window_bounds = array<i64: 2, 32, 32>}, {pipeline_mode = #tpu.pipeline_mode<synchronous>, transform_indices = @transform_7, window_bounds = array<i64: 2, 1, 32>}, {pipeline_mode = #tpu.pipeline_mode<synchronous>, transform_indices = @transform_8, window_bounds = array<i64: 2, 1, 32>}, {pipeline_mode = #tpu.pipeline_mode<synchronous>, transform_indices = @transform_9, window_bounds = array<i64: 2, 1, 32>}, {pipeline_mode = #tpu.pipeline_mode<synchronous>, transform_indices = @transform_10, window_bounds = array<i64: 2, 32, 64>}, {pipeline_mode = #tpu.pipeline_mode<synchronous>, transform_indices = @transform_11, window_bounds = array<i64: 2, 1, 64>}, {pipeline_mode = #tpu.pipeline_mode<synchronous>, transform_indices = @transform_12, window_bounds = array<i64: 2, 64, 32>}, {pipeline_mode = #tpu.pipeline_mode<synchronous>, transform_indices = @transform_13, window_bounds = array<i64: 2, 1, 32>}, {pipeline_mode = #tpu.pipeline_mode<synchronous>, transform_indices = @transform_14, window_bounds = array<i64: 2, 1, 32>}, {pipeline_mode = #tpu.pipeline_mode<synchronous>, transform_indices = @transform_15, window_bounds = array<i64: 2, 1, 32>}, {pipeline_mode = #tpu.pipeline_mode<synchronous>, transform_indices = @transform_16, window_bounds = array<i64: 32, 32>}, {pipeline_mode = #tpu.pipeline_mode<synchronous>, transform_indices = @transform_17, window_bounds = array<i64: 1, 32>}, {pipeline_mode = #tpu.pipeline_mode<synchronous>, transform_indices = @transform_18, window_bounds = array<i64: 1, 32>}, {pipeline_mode = #tpu.pipeline_mode<synchronous>, transform_indices = @transform_19, window_bounds = array<i64: 1, 32>}, {pipeline_mode = #tpu.pipeline_mode<synchronous>, transform_indices = @transform_20, window_bounds = array<i64: 128, 32>}, {pipeline_mode = #tpu.pipeline_mode<synchronous>, transform_indices = @transform_21, window_bounds = array<i64: 1, 128>}, {transform_indices = @transform_22, window_bounds = array<i64: 1, 8, 128>}]} {
    %c0 = arith.constant 0 : index
    %c0_0 = arith.constant 0 : index
    %c0_1 = arith.constant 0 : index
    %0 = vector.load %arg1[%c0, %c0_0, %c0_1] : memref<1x8x32xf32, #tpu.memory_space<vmem>>, vector<1x8x32xf32>
    %1 = vector.shape_cast %0 : vector<1x8x32xf32> to vector<8x32xf32>
    %c0_2 = arith.constant 0 : index
    %c0_3 = arith.constant 0 : index
    %2 = vector.load %arg3[%c0_2, %c0_3] : memref<1x32xf32, #tpu.memory_space<vmem>>, vector<1x32xf32>
    %c0_4 = arith.constant 0 : index
    %c0_5 = arith.constant 0 : index
    %3 = vector.load %arg4[%c0_4, %c0_5] : memref<1x32xf32, #tpu.memory_space<vmem>>, vector<1x32xf32>
    %cst = arith.constant dense<0.000000e+00> : vector<8xf32>
    %4 = vector.multi_reduction <add>, %1, %cst [1] : vector<8x32xf32> to vector<8xf32>
    %5 = vector.shape_cast %4 : vector<8xf32> to vector<8x1xf32>
    %cst_6 = arith.constant 3.200000e+01 : f32
    %6 = vector.broadcast %cst_6 : f32 to vector<8x1xf32>
    %7 = arith.divf %5, %6 : vector<8x1xf32>
    %8 = vector.broadcast %7 : vector<8x1xf32> to vector<8x32xf32>
    %9 = arith.subf %1, %8 : vector<8x32xf32>
    %10 = arith.mulf %9, %9 : vector<8x32xf32>
    %cst_7 = arith.constant dense<0.000000e+00> : vector<8xf32>
    %11 = vector.multi_reduction <add>, %10, %cst_7 [1] : vector<8x32xf32> to vector<8xf32>
    %12 = vector.shape_cast %11 : vector<8xf32> to vector<8x1xf32>
    %cst_8 = arith.constant 3.200000e+01 : f32
    %13 = vector.broadcast %cst_8 : f32 to vector<8x1xf32>
    %14 = arith.divf %12, %13 : vector<8x1xf32>
    %15 = vector.broadcast %7 : vector<8x1xf32> to vector<8x32xf32>
    %16 = arith.subf %1, %15 : vector<8x32xf32>
    %cst_9 = arith.constant 9.99999996E-13 : f32
    %17 = vector.broadcast %cst_9 : f32 to vector<8x1xf32>
    %18 = arith.addf %14, %17 : vector<8x1xf32>
    %19 = math.rsqrt %18 : vector<8x1xf32>
    %20 = vector.broadcast %19 : vector<8x1xf32> to vector<8x32xf32>
    %21 = arith.mulf %16, %20 : vector<8x32xf32>
    %22 = vector.broadcast %2 : vector<1x32xf32> to vector<8x32xf32>
    %23 = arith.mulf %21, %22 : vector<8x32xf32>
    %24 = vector.broadcast %3 : vector<1x32xf32> to vector<8x32xf32>
    %25 = arith.addf %23, %24 : vector<8x32xf32>
    %c0_10 = arith.constant 0 : index
    %c0_11 = arith.constant 0 : index
    %c0_12 = arith.constant 0 : index
    %26 = vector.load %arg2[%c0_10, %c0_11, %c0_12] : memref<1x1x8xf32, #tpu.memory_space<vmem>>, vector<1x1x8xf32>
    %27 = vector.shape_cast %26 : vector<1x1x8xf32> to vector<1x8xf32>
    %c0_13 = arith.constant 0 : index
    %c0_14 = arith.constant 0 : index
    %c0_15 = arith.constant 0 : index
    %28 = vector.load %arg5[%c0_13, %c0_14, %c0_15] : memref<2x32x96xbf16, #tpu.memory_space<vmem>>, vector<1x32x96xbf16>
    %29 = vector.shape_cast %28 : vector<1x32x96xbf16> to vector<32x96xbf16>
    %c0_16 = arith.constant 0 : index
    %c0_17 = arith.constant 0 : index
    %c0_18 = arith.constant 0 : index
    %30 = vector.load %arg6[%c0_16, %c0_17, %c0_18] : memref<2x1x96xf32, #tpu.memory_space<vmem>>, vector<1x1x96xf32>
    %31 = vector.shape_cast %30 : vector<1x1x96xf32> to vector<1x96xf32>
    %32 = arith.truncf %25 : vector<8x32xf32> to vector<8x32xbf16>
    %cst_19 = arith.constant dense<0.000000e+00> : vector<8x96xf32>
    %33 = tpu.matmul %32, %29, %cst_19 {dimension_numbers = #tpu.dot_dimension_numbers<[1], [0], [0], [1], [0, 0, 1, 1], [], []>} : vector<8x32xbf16>, vector<32x96xbf16>, vector<8x96xf32> -> vector<8x96xf32>
    %34 = vector.broadcast %31 : vector<1x96xf32> to vector<8x96xf32>
    %35 = arith.addf %33, %34 : vector<8x96xf32>
    %36 = vector.extract_strided_slice %35 {offsets = [0, 0], sizes = [8, 32], strides = [1, 1]} : vector<8x96xf32> to vector<8x32xf32>
    %37 = vector.extract_strided_slice %35 {offsets = [0, 32], sizes = [8, 32], strides = [1, 1]} : vector<8x96xf32> to vector<8x32xf32>
    %38 = vector.extract_strided_slice %35 {offsets = [0, 64], sizes = [8, 32], strides = [1, 1]} : vector<8x96xf32> to vector<8x32xf32>
    %39 = vector.extract_strided_slice %36 {offsets = [0, 0], sizes = [8, 8], strides = [1, 1]} : vector<8x32xf32> to vector<8x8xf32>
    %40 = vector.extract_strided_slice %37 {offsets = [0, 0], sizes = [8, 8], strides = [1, 1]} : vector<8x32xf32> to vector<8x8xf32>
    %41 = vector.extract_strided_slice %38 {offsets = [0, 0], sizes = [8, 8], strides = [1, 1]} : vector<8x32xf32> to vector<8x8xf32>
    %cst_20 = arith.constant dense<0.000000e+00> : vector<8x8xf32>
    %42 = tpu.matmul %39, %40, %cst_20 {dimension_numbers = #tpu.dot_dimension_numbers<[1], [1], [0], [0], [0, 0, 1, 0], [], []>} : vector<8x8xf32>, vector<8x8xf32>, vector<8x8xf32> -> vector<8x8xf32>
    %cst_21 = arith.constant 0.353553385 : f32
    %43 = vector.broadcast %cst_21 : f32 to vector<8x8xf32>
    %44 = arith.mulf %42, %43 : vector<8x8xf32>
    %45 = vector.broadcast %27 : vector<1x8xf32> to vector<8x8xf32>
    %46 = arith.addf %44, %45 : vector<8x8xf32>
    %cst_22 = arith.constant dense<0xFF800000> : vector<8xf32>
    %47 = vector.multi_reduction <maximumf>, %46, %cst_22 [1] : vector<8x8xf32> to vector<8xf32>
    %48 = vector.shape_cast %47 : vector<8xf32> to vector<8x1xf32>
    %49 = vector.broadcast %48 : vector<8x1xf32> to vector<8x8xf32>
    %50 = arith.subf %46, %49 : vector<8x8xf32>
    %51 = math.exp %50 : vector<8x8xf32>
    %cst_23 = arith.constant dense<0.000000e+00> : vector<8xf32>
    %52 = vector.multi_reduction <add>, %51, %cst_23 [1] : vector<8x8xf32> to vector<8xf32>
    %53 = vector.shape_cast %52 : vector<8xf32> to vector<8x1xf32>
    %54 = vector.broadcast %53 : vector<8x1xf32> to vector<8x8xf32>
    %55 = arith.divf %51, %54 : vector<8x8xf32>
    %cst_24 = arith.constant dense<0.000000e+00> : vector<8x8xf32>
    %56 = tpu.matmul %55, %41, %cst_24 {dimension_numbers = #tpu.dot_dimension_numbers<[1], [0], [0], [1], [0, 0, 1, 1], [], []>} : vector<8x8xf32>, vector<8x8xf32>, vector<8x8xf32> -> vector<8x8xf32>
    %57 = vector.extract_strided_slice %36 {offsets = [0, 8], sizes = [8, 8], strides = [1, 1]} : vector<8x32xf32> to vector<8x8xf32>
    %58 = vector.extract_strided_slice %37 {offsets = [0, 8], sizes = [8, 8], strides = [1, 1]} : vector<8x32xf32> to vector<8x8xf32>
    %59 = vector.extract_strided_slice %38 {offsets = [0, 8], sizes = [8, 8], strides = [1, 1]} : vector<8x32xf32> to vector<8x8xf32>
    %cst_25 = arith.constant dense<0.000000e+00> : vector<8x8xf32>
    %60 = tpu.matmul %57, %58, %cst_25 {dimension_numbers = #tpu.dot_dimension_numbers<[1], [1], [0], [0], [0, 0, 1, 0], [], []>} : vector<8x8xf32>, vector<8x8xf32>, vector<8x8xf32> -> vector<8x8xf32>
    %cst_26 = arith.constant 0.353553385 : f32
    %61 = vector.broadcast %cst_26 : f32 to vector<8x8xf32>
    %62 = arith.mulf %60, %61 : vector<8x8xf32>
    %63 = vector.broadcast %27 : vector<1x8xf32> to vector<8x8xf32>
    %64 = arith.addf %62, %63 : vector<8x8xf32>
    %cst_27 = arith.constant dense<0xFF800000> : vector<8xf32>
    %65 = vector.multi_reduction <maximumf>, %64, %cst_27 [1] : vector<8x8xf32> to vector<8xf32>
    %66 = vector.shape_cast %65 : vector<8xf32> to vector<8x1xf32>
    %67 = vector.broadcast %66 : vector<8x1xf32> to vector<8x8xf32>
    %68 = arith.subf %64, %67 : vector<8x8xf32>
    %69 = math.exp %68 : vector<8x8xf32>
    %cst_28 = arith.constant dense<0.000000e+00> : vector<8xf32>
    %70 = vector.multi_reduction <add>, %69, %cst_28 [1] : vector<8x8xf32> to vector<8xf32>
    %71 = vector.shape_cast %70 : vector<8xf32> to vector<8x1xf32>
    %72 = vector.broadcast %71 : vector<8x1xf32> to vector<8x8xf32>
    %73 = arith.divf %69, %72 : vector<8x8xf32>
    %cst_29 = arith.constant dense<0.000000e+00> : vector<8x8xf32>
    %74 = tpu.matmul %73, %59, %cst_29 {dimension_numbers = #tpu.dot_dimension_numbers<[1], [0], [0], [1], [0, 0, 1, 1], [], []>} : vector<8x8xf32>, vector<8x8xf32>, vector<8x8xf32> -> vector<8x8xf32>
    %75 = vector.extract_strided_slice %36 {offsets = [0, 16], sizes = [8, 8], strides = [1, 1]} : vector<8x32xf32> to vector<8x8xf32>
    %76 = vector.extract_strided_slice %37 {offsets = [0, 16], sizes = [8, 8], strides = [1, 1]} : vector<8x32xf32> to vector<8x8xf32>
    %77 = vector.extract_strided_slice %38 {offsets = [0, 16], sizes = [8, 8], strides = [1, 1]} : vector<8x32xf32> to vector<8x8xf32>
    %cst_30 = arith.constant dense<0.000000e+00> : vector<8x8xf32>
    %78 = tpu.matmul %75, %76, %cst_30 {dimension_numbers = #tpu.dot_dimension_numbers<[1], [1], [0], [0], [0, 0, 1, 0], [], []>} : vector<8x8xf32>, vector<8x8xf32>, vector<8x8xf32> -> vector<8x8xf32>
    %cst_31 = arith.constant 0.353553385 : f32
    %79 = vector.broadcast %cst_31 : f32 to vector<8x8xf32>
    %80 = arith.mulf %78, %79 : vector<8x8xf32>
    %81 = vector.broadcast %27 : vector<1x8xf32> to vector<8x8xf32>
    %82 = arith.addf %80, %81 : vector<8x8xf32>
    %cst_32 = arith.constant dense<0xFF800000> : vector<8xf32>
    %83 = vector.multi_reduction <maximumf>, %82, %cst_32 [1] : vector<8x8xf32> to vector<8xf32>
    %84 = vector.shape_cast %83 : vector<8xf32> to vector<8x1xf32>
    %85 = vector.broadcast %84 : vector<8x1xf32> to vector<8x8xf32>
    %86 = arith.subf %82, %85 : vector<8x8xf32>
    %87 = math.exp %86 : vector<8x8xf32>
    %cst_33 = arith.constant dense<0.000000e+00> : vector<8xf32>
    %88 = vector.multi_reduction <add>, %87, %cst_33 [1] : vector<8x8xf32> to vector<8xf32>
    %89 = vector.shape_cast %88 : vector<8xf32> to vector<8x1xf32>
    %90 = vector.broadcast %89 : vector<8x1xf32> to vector<8x8xf32>
    %91 = arith.divf %87, %90 : vector<8x8xf32>
    %cst_34 = arith.constant dense<0.000000e+00> : vector<8x8xf32>
    %92 = tpu.matmul %91, %77, %cst_34 {dimension_numbers = #tpu.dot_dimension_numbers<[1], [0], [0], [1], [0, 0, 1, 1], [], []>} : vector<8x8xf32>, vector<8x8xf32>, vector<8x8xf32> -> vector<8x8xf32>
    %93 = vector.extract_strided_slice %36 {offsets = [0, 24], sizes = [8, 8], strides = [1, 1]} : vector<8x32xf32> to vector<8x8xf32>
    %94 = vector.extract_strided_slice %37 {offsets = [0, 24], sizes = [8, 8], strides = [1, 1]} : vector<8x32xf32> to vector<8x8xf32>
    %95 = vector.extract_strided_slice %38 {offsets = [0, 24], sizes = [8, 8], strides = [1, 1]} : vector<8x32xf32> to vector<8x8xf32>
    %cst_35 = arith.constant dense<0.000000e+00> : vector<8x8xf32>
    %96 = tpu.matmul %93, %94, %cst_35 {dimension_numbers = #tpu.dot_dimension_numbers<[1], [1], [0], [0], [0, 0, 1, 0], [], []>} : vector<8x8xf32>, vector<8x8xf32>, vector<8x8xf32> -> vector<8x8xf32>
    %cst_36 = arith.constant 0.353553385 : f32
    %97 = vector.broadcast %cst_36 : f32 to vector<8x8xf32>
    %98 = arith.mulf %96, %97 : vector<8x8xf32>
    %99 = vector.broadcast %27 : vector<1x8xf32> to vector<8x8xf32>
    %100 = arith.addf %98, %99 : vector<8x8xf32>
    %cst_37 = arith.constant dense<0xFF800000> : vector<8xf32>
    %101 = vector.multi_reduction <maximumf>, %100, %cst_37 [1] : vector<8x8xf32> to vector<8xf32>
    %102 = vector.shape_cast %101 : vector<8xf32> to vector<8x1xf32>
    %103 = vector.broadcast %102 : vector<8x1xf32> to vector<8x8xf32>
    %104 = arith.subf %100, %103 : vector<8x8xf32>
    %105 = math.exp %104 : vector<8x8xf32>
    %cst_38 = arith.constant dense<0.000000e+00> : vector<8xf32>
    %106 = vector.multi_reduction <add>, %105, %cst_38 [1] : vector<8x8xf32> to vector<8xf32>
    %107 = vector.shape_cast %106 : vector<8xf32> to vector<8x1xf32>
    %108 = vector.broadcast %107 : vector<8x1xf32> to vector<8x8xf32>
    %109 = arith.divf %105, %108 : vector<8x8xf32>
    %cst_39 = arith.constant dense<0.000000e+00> : vector<8x8xf32>
    %110 = tpu.matmul %109, %95, %cst_39 {dimension_numbers = #tpu.dot_dimension_numbers<[1], [0], [0], [1], [0, 0, 1, 1], [], []>} : vector<8x8xf32>, vector<8x8xf32>, vector<8x8xf32> -> vector<8x8xf32>
    %111 = tpu.concatenate %56, %74, %92, %110 in 1 : vector<8x8xf32>, vector<8x8xf32>, vector<8x8xf32>, vector<8x8xf32> -> vector<8x32xf32>
    %c0_40 = arith.constant 0 : index
    %c0_41 = arith.constant 0 : index
    %c0_42 = arith.constant 0 : index
    %112 = vector.load %arg7[%c0_40, %c0_41, %c0_42] : memref<2x32x32xbf16, #tpu.memory_space<vmem>>, vector<1x32x32xbf16>
    %113 = vector.shape_cast %112 : vector<1x32x32xbf16> to vector<32x32xbf16>
    %c0_43 = arith.constant 0 : index
    %c0_44 = arith.constant 0 : index
    %c0_45 = arith.constant 0 : index
    %114 = vector.load %arg8[%c0_43, %c0_44, %c0_45] : memref<2x1x32xf32, #tpu.memory_space<vmem>>, vector<1x1x32xf32>
    %115 = vector.shape_cast %114 : vector<1x1x32xf32> to vector<1x32xf32>
    %116 = arith.truncf %111 : vector<8x32xf32> to vector<8x32xbf16>
    %cst_46 = arith.constant dense<0.000000e+00> : vector<8x32xf32>
    %117 = tpu.matmul %116, %113, %cst_46 {dimension_numbers = #tpu.dot_dimension_numbers<[1], [0], [0], [1], [0, 0, 1, 1], [], []>} : vector<8x32xbf16>, vector<32x32xbf16>, vector<8x32xf32> -> vector<8x32xf32>
    %118 = vector.broadcast %115 : vector<1x32xf32> to vector<8x32xf32>
    %119 = arith.addf %117, %118 : vector<8x32xf32>
    %120 = arith.addf %119, %25 : vector<8x32xf32>
    %c0_47 = arith.constant 0 : index
    %c0_48 = arith.constant 0 : index
    %c0_49 = arith.constant 0 : index
    %121 = vector.load %arg9[%c0_47, %c0_48, %c0_49] : memref<2x1x32xf32, #tpu.memory_space<vmem>>, vector<1x1x32xf32>
    %122 = vector.shape_cast %121 : vector<1x1x32xf32> to vector<1x32xf32>
    %c0_50 = arith.constant 0 : index
    %c0_51 = arith.constant 0 : index
    %c0_52 = arith.constant 0 : index
    %123 = vector.load %arg10[%c0_50, %c0_51, %c0_52] : memref<2x1x32xf32, #tpu.memory_space<vmem>>, vector<1x1x32xf32>
    %124 = vector.shape_cast %123 : vector<1x1x32xf32> to vector<1x32xf32>
    %cst_53 = arith.constant dense<0.000000e+00> : vector<8xf32>
    %125 = vector.multi_reduction <add>, %120, %cst_53 [1] : vector<8x32xf32> to vector<8xf32>
    %126 = vector.shape_cast %125 : vector<8xf32> to vector<8x1xf32>
    %cst_54 = arith.constant 3.200000e+01 : f32
    %127 = vector.broadcast %cst_54 : f32 to vector<8x1xf32>
    %128 = arith.divf %126, %127 : vector<8x1xf32>
    %129 = vector.broadcast %128 : vector<8x1xf32> to vector<8x32xf32>
    %130 = arith.subf %120, %129 : vector<8x32xf32>
    %131 = arith.mulf %130, %130 : vector<8x32xf32>
    %cst_55 = arith.constant dense<0.000000e+00> : vector<8xf32>
    %132 = vector.multi_reduction <add>, %131, %cst_55 [1] : vector<8x32xf32> to vector<8xf32>
    %133 = vector.shape_cast %132 : vector<8xf32> to vector<8x1xf32>
    %cst_56 = arith.constant 3.200000e+01 : f32
    %134 = vector.broadcast %cst_56 : f32 to vector<8x1xf32>
    %135 = arith.divf %133, %134 : vector<8x1xf32>
    %136 = vector.broadcast %128 : vector<8x1xf32> to vector<8x32xf32>
    %137 = arith.subf %120, %136 : vector<8x32xf32>
    %cst_57 = arith.constant 9.99999996E-13 : f32
    %138 = vector.broadcast %cst_57 : f32 to vector<8x1xf32>
    %139 = arith.addf %135, %138 : vector<8x1xf32>
    %140 = math.rsqrt %139 : vector<8x1xf32>
    %141 = vector.broadcast %140 : vector<8x1xf32> to vector<8x32xf32>
    %142 = arith.mulf %137, %141 : vector<8x32xf32>
    %143 = vector.broadcast %122 : vector<1x32xf32> to vector<8x32xf32>
    %144 = arith.mulf %142, %143 : vector<8x32xf32>
    %145 = vector.broadcast %124 : vector<1x32xf32> to vector<8x32xf32>
    %146 = arith.addf %144, %145 : vector<8x32xf32>
    %c0_58 = arith.constant 0 : index
    %c0_59 = arith.constant 0 : index
    %c0_60 = arith.constant 0 : index
    %147 = vector.load %arg11[%c0_58, %c0_59, %c0_60] : memref<2x32x64xbf16, #tpu.memory_space<vmem>>, vector<1x32x64xbf16>
    %148 = vector.shape_cast %147 : vector<1x32x64xbf16> to vector<32x64xbf16>
    %c0_61 = arith.constant 0 : index
    %c0_62 = arith.constant 0 : index
    %c0_63 = arith.constant 0 : index
    %149 = vector.load %arg12[%c0_61, %c0_62, %c0_63] : memref<2x1x64xf32, #tpu.memory_space<vmem>>, vector<1x1x64xf32>
    %150 = vector.shape_cast %149 : vector<1x1x64xf32> to vector<1x64xf32>
    %151 = arith.truncf %146 : vector<8x32xf32> to vector<8x32xbf16>
    %cst_64 = arith.constant dense<0.000000e+00> : vector<8x64xf32>
    %152 = tpu.matmul %151, %148, %cst_64 {dimension_numbers = #tpu.dot_dimension_numbers<[1], [0], [0], [1], [0, 0, 1, 1], [], []>} : vector<8x32xbf16>, vector<32x64xbf16>, vector<8x64xf32> -> vector<8x64xf32>
    %153 = vector.broadcast %150 : vector<1x64xf32> to vector<8x64xf32>
    %154 = arith.addf %152, %153 : vector<8x64xf32>
    %cst_65 = arith.constant 5.000000e-01 : f32
    %155 = vector.broadcast %cst_65 : f32 to vector<8x64xf32>
    %156 = arith.mulf %155, %154 : vector<8x64xf32>
    %cst_66 = arith.constant 0.707106769 : f32
    %157 = vector.broadcast %cst_66 : f32 to vector<8x64xf32>
    %158 = arith.mulf %154, %157 : vector<8x64xf32>
    %159 = math.erf %158 : vector<8x64xf32>
    %cst_67 = arith.constant 1.000000e+00 : f32
    %160 = vector.broadcast %cst_67 : f32 to vector<8x64xf32>
    %161 = arith.addf %160, %159 : vector<8x64xf32>
    %162 = arith.mulf %156, %161 : vector<8x64xf32>
    %c0_68 = arith.constant 0 : index
    %c0_69 = arith.constant 0 : index
    %c0_70 = arith.constant 0 : index
    %163 = vector.load %arg13[%c0_68, %c0_69, %c0_70] : memref<2x64x32xbf16, #tpu.memory_space<vmem>>, vector<1x64x32xbf16>
    %164 = vector.shape_cast %163 : vector<1x64x32xbf16> to vector<64x32xbf16>
    %c0_71 = arith.constant 0 : index
    %c0_72 = arith.constant 0 : index
    %c0_73 = arith.constant 0 : index
    %165 = vector.load %arg14[%c0_71, %c0_72, %c0_73] : memref<2x1x32xf32, #tpu.memory_space<vmem>>, vector<1x1x32xf32>
    %166 = vector.shape_cast %165 : vector<1x1x32xf32> to vector<1x32xf32>
    %167 = arith.truncf %162 : vector<8x64xf32> to vector<8x64xbf16>
    %cst_74 = arith.constant dense<0.000000e+00> : vector<8x32xf32>
    %168 = tpu.matmul %167, %164, %cst_74 {dimension_numbers = #tpu.dot_dimension_numbers<[1], [0], [0], [1], [0, 0, 1, 1], [], []>} : vector<8x64xbf16>, vector<64x32xbf16>, vector<8x32xf32> -> vector<8x32xf32>
    %169 = vector.broadcast %166 : vector<1x32xf32> to vector<8x32xf32>
    %170 = arith.addf %168, %169 : vector<8x32xf32>
    %171 = arith.addf %170, %146 : vector<8x32xf32>
    %c0_75 = arith.constant 0 : index
    %c0_76 = arith.constant 0 : index
    %c0_77 = arith.constant 0 : index
    %172 = vector.load %arg15[%c0_75, %c0_76, %c0_77] : memref<2x1x32xf32, #tpu.memory_space<vmem>>, vector<1x1x32xf32>
    %173 = vector.shape_cast %172 : vector<1x1x32xf32> to vector<1x32xf32>
    %c0_78 = arith.constant 0 : index
    %c0_79 = arith.constant 0 : index
    %c0_80 = arith.constant 0 : index
    %174 = vector.load %arg16[%c0_78, %c0_79, %c0_80] : memref<2x1x32xf32, #tpu.memory_space<vmem>>, vector<1x1x32xf32>
    %175 = vector.shape_cast %174 : vector<1x1x32xf32> to vector<1x32xf32>
    %cst_81 = arith.constant dense<0.000000e+00> : vector<8xf32>
    %176 = vector.multi_reduction <add>, %171, %cst_81 [1] : vector<8x32xf32> to vector<8xf32>
    %177 = vector.shape_cast %176 : vector<8xf32> to vector<8x1xf32>
    %cst_82 = arith.constant 3.200000e+01 : f32
    %178 = vector.broadcast %cst_82 : f32 to vector<8x1xf32>
    %179 = arith.divf %177, %178 : vector<8x1xf32>
    %180 = vector.broadcast %179 : vector<8x1xf32> to vector<8x32xf32>
    %181 = arith.subf %171, %180 : vector<8x32xf32>
    %182 = arith.mulf %181, %181 : vector<8x32xf32>
    %cst_83 = arith.constant dense<0.000000e+00> : vector<8xf32>
    %183 = vector.multi_reduction <add>, %182, %cst_83 [1] : vector<8x32xf32> to vector<8xf32>
    %184 = vector.shape_cast %183 : vector<8xf32> to vector<8x1xf32>
    %cst_84 = arith.constant 3.200000e+01 : f32
    %185 = vector.broadcast %cst_84 : f32 to vector<8x1xf32>
    %186 = arith.divf %184, %185 : vector<8x1xf32>
    %187 = vector.broadcast %179 : vector<8x1xf32> to vector<8x32xf32>
    %188 = arith.subf %171, %187 : vector<8x32xf32>
    %cst_85 = arith.constant 9.99999996E-13 : f32
    %189 = vector.broadcast %cst_85 : f32 to vector<8x1xf32>
    %190 = arith.addf %186, %189 : vector<8x1xf32>
    %191 = math.rsqrt %190 : vector<8x1xf32>
    %192 = vector.broadcast %191 : vector<8x1xf32> to vector<8x32xf32>
    %193 = arith.mulf %188, %192 : vector<8x32xf32>
    %194 = vector.broadcast %173 : vector<1x32xf32> to vector<8x32xf32>
    %195 = arith.mulf %193, %194 : vector<8x32xf32>
    %196 = vector.broadcast %175 : vector<1x32xf32> to vector<8x32xf32>
    %197 = arith.addf %195, %196 : vector<8x32xf32>
    %c1 = arith.constant 1 : index
    %c0_86 = arith.constant 0 : index
    %c0_87 = arith.constant 0 : index
    %198 = vector.load %arg5[%c1, %c0_86, %c0_87] : memref<2x32x96xbf16, #tpu.memory_space<vmem>>, vector<1x32x96xbf16>
    %199 = vector.shape_cast %198 : vector<1x32x96xbf16> to vector<32x96xbf16>
    %c1_88 = arith.constant 1 : index
    %c0_89 = arith.constant 0 : index
    %c0_90 = arith.constant 0 : index
    %200 = vector.load %arg6[%c1_88, %c0_89, %c0_90] : memref<2x1x96xf32, #tpu.memory_space<vmem>>, vector<1x1x96xf32>
    %201 = vector.shape_cast %200 : vector<1x1x96xf32> to vector<1x96xf32>
    %202 = arith.truncf %197 : vector<8x32xf32> to vector<8x32xbf16>
    %cst_91 = arith.constant dense<0.000000e+00> : vector<8x96xf32>
    %203 = tpu.matmul %202, %199, %cst_91 {dimension_numbers = #tpu.dot_dimension_numbers<[1], [0], [0], [1], [0, 0, 1, 1], [], []>} : vector<8x32xbf16>, vector<32x96xbf16>, vector<8x96xf32> -> vector<8x96xf32>
    %204 = vector.broadcast %201 : vector<1x96xf32> to vector<8x96xf32>
    %205 = arith.addf %203, %204 : vector<8x96xf32>
    %206 = vector.extract_strided_slice %205 {offsets = [0, 0], sizes = [8, 32], strides = [1, 1]} : vector<8x96xf32> to vector<8x32xf32>
    %207 = vector.extract_strided_slice %205 {offsets = [0, 32], sizes = [8, 32], strides = [1, 1]} : vector<8x96xf32> to vector<8x32xf32>
    %208 = vector.extract_strided_slice %205 {offsets = [0, 64], sizes = [8, 32], strides = [1, 1]} : vector<8x96xf32> to vector<8x32xf32>
    %209 = vector.extract_strided_slice %206 {offsets = [0, 0], sizes = [8, 8], strides = [1, 1]} : vector<8x32xf32> to vector<8x8xf32>
    %210 = vector.extract_strided_slice %207 {offsets = [0, 0], sizes = [8, 8], strides = [1, 1]} : vector<8x32xf32> to vector<8x8xf32>
    %211 = vector.extract_strided_slice %208 {offsets = [0, 0], sizes = [8, 8], strides = [1, 1]} : vector<8x32xf32> to vector<8x8xf32>
    %cst_92 = arith.constant dense<0.000000e+00> : vector<8x8xf32>
    %212 = tpu.matmul %209, %210, %cst_92 {dimension_numbers = #tpu.dot_dimension_numbers<[1], [1], [0], [0], [0, 0, 1, 0], [], []>} : vector<8x8xf32>, vector<8x8xf32>, vector<8x8xf32> -> vector<8x8xf32>
    %cst_93 = arith.constant 0.353553385 : f32
    %213 = vector.broadcast %cst_93 : f32 to vector<8x8xf32>
    %214 = arith.mulf %212, %213 : vector<8x8xf32>
    %215 = vector.broadcast %27 : vector<1x8xf32> to vector<8x8xf32>
    %216 = arith.addf %214, %215 : vector<8x8xf32>
    %cst_94 = arith.constant dense<0xFF800000> : vector<8xf32>
    %217 = vector.multi_reduction <maximumf>, %216, %cst_94 [1] : vector<8x8xf32> to vector<8xf32>
    %218 = vector.shape_cast %217 : vector<8xf32> to vector<8x1xf32>
    %219 = vector.broadcast %218 : vector<8x1xf32> to vector<8x8xf32>
    %220 = arith.subf %216, %219 : vector<8x8xf32>
    %221 = math.exp %220 : vector<8x8xf32>
    %cst_95 = arith.constant dense<0.000000e+00> : vector<8xf32>
    %222 = vector.multi_reduction <add>, %221, %cst_95 [1] : vector<8x8xf32> to vector<8xf32>
    %223 = vector.shape_cast %222 : vector<8xf32> to vector<8x1xf32>
    %224 = vector.broadcast %223 : vector<8x1xf32> to vector<8x8xf32>
    %225 = arith.divf %221, %224 : vector<8x8xf32>
    %cst_96 = arith.constant dense<0.000000e+00> : vector<8x8xf32>
    %226 = tpu.matmul %225, %211, %cst_96 {dimension_numbers = #tpu.dot_dimension_numbers<[1], [0], [0], [1], [0, 0, 1, 1], [], []>} : vector<8x8xf32>, vector<8x8xf32>, vector<8x8xf32> -> vector<8x8xf32>
    %227 = vector.extract_strided_slice %206 {offsets = [0, 8], sizes = [8, 8], strides = [1, 1]} : vector<8x32xf32> to vector<8x8xf32>
    %228 = vector.extract_strided_slice %207 {offsets = [0, 8], sizes = [8, 8], strides = [1, 1]} : vector<8x32xf32> to vector<8x8xf32>
    %229 = vector.extract_strided_slice %208 {offsets = [0, 8], sizes = [8, 8], strides = [1, 1]} : vector<8x32xf32> to vector<8x8xf32>
    %cst_97 = arith.constant dense<0.000000e+00> : vector<8x8xf32>
    %230 = tpu.matmul %227, %228, %cst_97 {dimension_numbers = #tpu.dot_dimension_numbers<[1], [1], [0], [0], [0, 0, 1, 0], [], []>} : vector<8x8xf32>, vector<8x8xf32>, vector<8x8xf32> -> vector<8x8xf32>
    %cst_98 = arith.constant 0.353553385 : f32
    %231 = vector.broadcast %cst_98 : f32 to vector<8x8xf32>
    %232 = arith.mulf %230, %231 : vector<8x8xf32>
    %233 = vector.broadcast %27 : vector<1x8xf32> to vector<8x8xf32>
    %234 = arith.addf %232, %233 : vector<8x8xf32>
    %cst_99 = arith.constant dense<0xFF800000> : vector<8xf32>
    %235 = vector.multi_reduction <maximumf>, %234, %cst_99 [1] : vector<8x8xf32> to vector<8xf32>
    %236 = vector.shape_cast %235 : vector<8xf32> to vector<8x1xf32>
    %237 = vector.broadcast %236 : vector<8x1xf32> to vector<8x8xf32>
    %238 = arith.subf %234, %237 : vector<8x8xf32>
    %239 = math.exp %238 : vector<8x8xf32>
    %cst_100 = arith.constant dense<0.000000e+00> : vector<8xf32>
    %240 = vector.multi_reduction <add>, %239, %cst_100 [1] : vector<8x8xf32> to vector<8xf32>
    %241 = vector.shape_cast %240 : vector<8xf32> to vector<8x1xf32>
    %242 = vector.broadcast %241 : vector<8x1xf32> to vector<8x8xf32>
    %243 = arith.divf %239, %242 : vector<8x8xf32>
    %cst_101 = arith.constant dense<0.000000e+00> : vector<8x8xf32>
    %244 = tpu.matmul %243, %229, %cst_101 {dimension_numbers = #tpu.dot_dimension_numbers<[1], [0], [0], [1], [0, 0, 1, 1], [], []>} : vector<8x8xf32>, vector<8x8xf32>, vector<8x8xf32> -> vector<8x8xf32>
    %245 = vector.extract_strided_slice %206 {offsets = [0, 16], sizes = [8, 8], strides = [1, 1]} : vector<8x32xf32> to vector<8x8xf32>
    %246 = vector.extract_strided_slice %207 {offsets = [0, 16], sizes = [8, 8], strides = [1, 1]} : vector<8x32xf32> to vector<8x8xf32>
    %247 = vector.extract_strided_slice %208 {offsets = [0, 16], sizes = [8, 8], strides = [1, 1]} : vector<8x32xf32> to vector<8x8xf32>
    %cst_102 = arith.constant dense<0.000000e+00> : vector<8x8xf32>
    %248 = tpu.matmul %245, %246, %cst_102 {dimension_numbers = #tpu.dot_dimension_numbers<[1], [1], [0], [0], [0, 0, 1, 0], [], []>} : vector<8x8xf32>, vector<8x8xf32>, vector<8x8xf32> -> vector<8x8xf32>
    %cst_103 = arith.constant 0.353553385 : f32
    %249 = vector.broadcast %cst_103 : f32 to vector<8x8xf32>
    %250 = arith.mulf %248, %249 : vector<8x8xf32>
    %251 = vector.broadcast %27 : vector<1x8xf32> to vector<8x8xf32>
    %252 = arith.addf %250, %251 : vector<8x8xf32>
    %cst_104 = arith.constant dense<0xFF800000> : vector<8xf32>
    %253 = vector.multi_reduction <maximumf>, %252, %cst_104 [1] : vector<8x8xf32> to vector<8xf32>
    %254 = vector.shape_cast %253 : vector<8xf32> to vector<8x1xf32>
    %255 = vector.broadcast %254 : vector<8x1xf32> to vector<8x8xf32>
    %256 = arith.subf %252, %255 : vector<8x8xf32>
    %257 = math.exp %256 : vector<8x8xf32>
    %cst_105 = arith.constant dense<0.000000e+00> : vector<8xf32>
    %258 = vector.multi_reduction <add>, %257, %cst_105 [1] : vector<8x8xf32> to vector<8xf32>
    %259 = vector.shape_cast %258 : vector<8xf32> to vector<8x1xf32>
    %260 = vector.broadcast %259 : vector<8x1xf32> to vector<8x8xf32>
    %261 = arith.divf %257, %260 : vector<8x8xf32>
    %cst_106 = arith.constant dense<0.000000e+00> : vector<8x8xf32>
    %262 = tpu.matmul %261, %247, %cst_106 {dimension_numbers = #tpu.dot_dimension_numbers<[1], [0], [0], [1], [0, 0, 1, 1], [], []>} : vector<8x8xf32>, vector<8x8xf32>, vector<8x8xf32> -> vector<8x8xf32>
    %263 = vector.extract_strided_slice %206 {offsets = [0, 24], sizes = [8, 8], strides = [1, 1]} : vector<8x32xf32> to vector<8x8xf32>
    %264 = vector.extract_strided_slice %207 {offsets = [0, 24], sizes = [8, 8], strides = [1, 1]} : vector<8x32xf32> to vector<8x8xf32>
    %265 = vector.extract_strided_slice %208 {offsets = [0, 24], sizes = [8, 8], strides = [1, 1]} : vector<8x32xf32> to vector<8x8xf32>
    %cst_107 = arith.constant dense<0.000000e+00> : vector<8x8xf32>
    %266 = tpu.matmul %263, %264, %cst_107 {dimension_numbers = #tpu.dot_dimension_numbers<[1], [1], [0], [0], [0, 0, 1, 0], [], []>} : vector<8x8xf32>, vector<8x8xf32>, vector<8x8xf32> -> vector<8x8xf32>
    %cst_108 = arith.constant 0.353553385 : f32
    %267 = vector.broadcast %cst_108 : f32 to vector<8x8xf32>
    %268 = arith.mulf %266, %267 : vector<8x8xf32>
    %269 = vector.broadcast %27 : vector<1x8xf32> to vector<8x8xf32>
    %270 = arith.addf %268, %269 : vector<8x8xf32>
    %cst_109 = arith.constant dense<0xFF800000> : vector<8xf32>
    %271 = vector.multi_reduction <maximumf>, %270, %cst_109 [1] : vector<8x8xf32> to vector<8xf32>
    %272 = vector.shape_cast %271 : vector<8xf32> to vector<8x1xf32>
    %273 = vector.broadcast %272 : vector<8x1xf32> to vector<8x8xf32>
    %274 = arith.subf %270, %273 : vector<8x8xf32>
    %275 = math.exp %274 : vector<8x8xf32>
    %cst_110 = arith.constant dense<0.000000e+00> : vector<8xf32>
    %276 = vector.multi_reduction <add>, %275, %cst_110 [1] : vector<8x8xf32> to vector<8xf32>
    %277 = vector.shape_cast %276 : vector<8xf32> to vector<8x1xf32>
    %278 = vector.broadcast %277 : vector<8x1xf32> to vector<8x8xf32>
    %279 = arith.divf %275, %278 : vector<8x8xf32>
    %cst_111 = arith.constant dense<0.000000e+00> : vector<8x8xf32>
    %280 = tpu.matmul %279, %265, %cst_111 {dimension_numbers = #tpu.dot_dimension_numbers<[1], [0], [0], [1], [0, 0, 1, 1], [], []>} : vector<8x8xf32>, vector<8x8xf32>, vector<8x8xf32> -> vector<8x8xf32>
    %281 = tpu.concatenate %226, %244, %262, %280 in 1 : vector<8x8xf32>, vector<8x8xf32>, vector<8x8xf32>, vector<8x8xf32> -> vector<8x32xf32>
    %c1_112 = arith.constant 1 : index
    %c0_113 = arith.constant 0 : index
    %c0_114 = arith.constant 0 : index
    %282 = vector.load %arg7[%c1_112, %c0_113, %c0_114] : memref<2x32x32xbf16, #tpu.memory_space<vmem>>, vector<1x32x32xbf16>
    %283 = vector.shape_cast %282 : vector<1x32x32xbf16> to vector<32x32xbf16>
    %c1_115 = arith.constant 1 : index
    %c0_116 = arith.constant 0 : index
    %c0_117 = arith.constant 0 : index
    %284 = vector.load %arg8[%c1_115, %c0_116, %c0_117] : memref<2x1x32xf32, #tpu.memory_space<vmem>>, vector<1x1x32xf32>
    %285 = vector.shape_cast %284 : vector<1x1x32xf32> to vector<1x32xf32>
    %286 = arith.truncf %281 : vector<8x32xf32> to vector<8x32xbf16>
    %cst_118 = arith.constant dense<0.000000e+00> : vector<8x32xf32>
    %287 = tpu.matmul %286, %283, %cst_118 {dimension_numbers = #tpu.dot_dimension_numbers<[1], [0], [0], [1], [0, 0, 1, 1], [], []>} : vector<8x32xbf16>, vector<32x32xbf16>, vector<8x32xf32> -> vector<8x32xf32>
    %288 = vector.broadcast %285 : vector<1x32xf32> to vector<8x32xf32>
    %289 = arith.addf %287, %288 : vector<8x32xf32>
    %290 = arith.addf %289, %197 : vector<8x32xf32>
    %c1_119 = arith.constant 1 : index
    %c0_120 = arith.constant 0 : index
    %c0_121 = arith.constant 0 : index
    %291 = vector.load %arg9[%c1_119, %c0_120, %c0_121] : memref<2x1x32xf32, #tpu.memory_space<vmem>>, vector<1x1x32xf32>
    %292 = vector.shape_cast %291 : vector<1x1x32xf32> to vector<1x32xf32>
    %c1_122 = arith.constant 1 : index
    %c0_123 = arith.constant 0 : index
    %c0_124 = arith.constant 0 : index
    %293 = vector.load %arg10[%c1_122, %c0_123, %c0_124] : memref<2x1x32xf32, #tpu.memory_space<vmem>>, vector<1x1x32xf32>
    %294 = vector.shape_cast %293 : vector<1x1x32xf32> to vector<1x32xf32>
    %cst_125 = arith.constant dense<0.000000e+00> : vector<8xf32>
    %295 = vector.multi_reduction <add>, %290, %cst_125 [1] : vector<8x32xf32> to vector<8xf32>
    %296 = vector.shape_cast %295 : vector<8xf32> to vector<8x1xf32>
    %cst_126 = arith.constant 3.200000e+01 : f32
    %297 = vector.broadcast %cst_126 : f32 to vector<8x1xf32>
    %298 = arith.divf %296, %297 : vector<8x1xf32>
    %299 = vector.broadcast %298 : vector<8x1xf32> to vector<8x32xf32>
    %300 = arith.subf %290, %299 : vector<8x32xf32>
    %301 = arith.mulf %300, %300 : vector<8x32xf32>
    %cst_127 = arith.constant dense<0.000000e+00> : vector<8xf32>
    %302 = vector.multi_reduction <add>, %301, %cst_127 [1] : vector<8x32xf32> to vector<8xf32>
    %303 = vector.shape_cast %302 : vector<8xf32> to vector<8x1xf32>
    %cst_128 = arith.constant 3.200000e+01 : f32
    %304 = vector.broadcast %cst_128 : f32 to vector<8x1xf32>
    %305 = arith.divf %303, %304 : vector<8x1xf32>
    %306 = vector.broadcast %298 : vector<8x1xf32> to vector<8x32xf32>
    %307 = arith.subf %290, %306 : vector<8x32xf32>
    %cst_129 = arith.constant 9.99999996E-13 : f32
    %308 = vector.broadcast %cst_129 : f32 to vector<8x1xf32>
    %309 = arith.addf %305, %308 : vector<8x1xf32>
    %310 = math.rsqrt %309 : vector<8x1xf32>
    %311 = vector.broadcast %310 : vector<8x1xf32> to vector<8x32xf32>
    %312 = arith.mulf %307, %311 : vector<8x32xf32>
    %313 = vector.broadcast %292 : vector<1x32xf32> to vector<8x32xf32>
    %314 = arith.mulf %312, %313 : vector<8x32xf32>
    %315 = vector.broadcast %294 : vector<1x32xf32> to vector<8x32xf32>
    %316 = arith.addf %314, %315 : vector<8x32xf32>
    %c1_130 = arith.constant 1 : index
    %c0_131 = arith.constant 0 : index
    %c0_132 = arith.constant 0 : index
    %317 = vector.load %arg11[%c1_130, %c0_131, %c0_132] : memref<2x32x64xbf16, #tpu.memory_space<vmem>>, vector<1x32x64xbf16>
    %318 = vector.shape_cast %317 : vector<1x32x64xbf16> to vector<32x64xbf16>
    %c1_133 = arith.constant 1 : index
    %c0_134 = arith.constant 0 : index
    %c0_135 = arith.constant 0 : index
    %319 = vector.load %arg12[%c1_133, %c0_134, %c0_135] : memref<2x1x64xf32, #tpu.memory_space<vmem>>, vector<1x1x64xf32>
    %320 = vector.shape_cast %319 : vector<1x1x64xf32> to vector<1x64xf32>
    %321 = arith.truncf %316 : vector<8x32xf32> to vector<8x32xbf16>
    %cst_136 = arith.constant dense<0.000000e+00> : vector<8x64xf32>
    %322 = tpu.matmul %321, %318, %cst_136 {dimension_numbers = #tpu.dot_dimension_numbers<[1], [0], [0], [1], [0, 0, 1, 1], [], []>} : vector<8x32xbf16>, vector<32x64xbf16>, vector<8x64xf32> -> vector<8x64xf32>
    %323 = vector.broadcast %320 : vector<1x64xf32> to vector<8x64xf32>
    %324 = arith.addf %322, %323 : vector<8x64xf32>
    %cst_137 = arith.constant 5.000000e-01 : f32
    %325 = vector.broadcast %cst_137 : f32 to vector<8x64xf32>
    %326 = arith.mulf %325, %324 : vector<8x64xf32>
    %cst_138 = arith.constant 0.707106769 : f32
    %327 = vector.broadcast %cst_138 : f32 to vector<8x64xf32>
    %328 = arith.mulf %324, %327 : vector<8x64xf32>
    %329 = math.erf %328 : vector<8x64xf32>
    %cst_139 = arith.constant 1.000000e+00 : f32
    %330 = vector.broadcast %cst_139 : f32 to vector<8x64xf32>
    %331 = arith.addf %330, %329 : vector<8x64xf32>
    %332 = arith.mulf %326, %331 : vector<8x64xf32>
    %c1_140 = arith.constant 1 : index
    %c0_141 = arith.constant 0 : index
    %c0_142 = arith.constant 0 : index
    %333 = vector.load %arg13[%c1_140, %c0_141, %c0_142] : memref<2x64x32xbf16, #tpu.memory_space<vmem>>, vector<1x64x32xbf16>
    %334 = vector.shape_cast %333 : vector<1x64x32xbf16> to vector<64x32xbf16>
    %c1_143 = arith.constant 1 : index
    %c0_144 = arith.constant 0 : index
    %c0_145 = arith.constant 0 : index
    %335 = vector.load %arg14[%c1_143, %c0_144, %c0_145] : memref<2x1x32xf32, #tpu.memory_space<vmem>>, vector<1x1x32xf32>
    %336 = vector.shape_cast %335 : vector<1x1x32xf32> to vector<1x32xf32>
    %337 = arith.truncf %332 : vector<8x64xf32> to vector<8x64xbf16>
    %cst_146 = arith.constant dense<0.000000e+00> : vector<8x32xf32>
    %338 = tpu.matmul %337, %334, %cst_146 {dimension_numbers = #tpu.dot_dimension_numbers<[1], [0], [0], [1], [0, 0, 1, 1], [], []>} : vector<8x64xbf16>, vector<64x32xbf16>, vector<8x32xf32> -> vector<8x32xf32>
    %339 = vector.broadcast %336 : vector<1x32xf32> to vector<8x32xf32>
    %340 = arith.addf %338, %339 : vector<8x32xf32>
    %341 = arith.addf %340, %316 : vector<8x32xf32>
    %c1_147 = arith.constant 1 : index
    %c0_148 = arith.constant 0 : index
    %c0_149 = arith.constant 0 : index
    %342 = vector.load %arg15[%c1_147, %c0_148, %c0_149] : memref<2x1x32xf32, #tpu.memory_space<vmem>>, vector<1x1x32xf32>
    %343 = vector.shape_cast %342 : vector<1x1x32xf32> to vector<1x32xf32>
    %c1_150 = arith.constant 1 : index
    %c0_151 = arith.constant 0 : index
    %c0_152 = arith.constant 0 : index
    %344 = vector.load %arg16[%c1_150, %c0_151, %c0_152] : memref<2x1x32xf32, #tpu.memory_space<vmem>>, vector<1x1x32xf32>
    %345 = vector.shape_cast %344 : vector<1x1x32xf32> to vector<1x32xf32>
    %cst_153 = arith.constant dense<0.000000e+00> : vector<8xf32>
    %346 = vector.multi_reduction <add>, %341, %cst_153 [1] : vector<8x32xf32> to vector<8xf32>
    %347 = vector.shape_cast %346 : vector<8xf32> to vector<8x1xf32>
    %cst_154 = arith.constant 3.200000e+01 : f32
    %348 = vector.broadcast %cst_154 : f32 to vector<8x1xf32>
    %349 = arith.divf %347, %348 : vector<8x1xf32>
    %350 = vector.broadcast %349 : vector<8x1xf32> to vector<8x32xf32>
    %351 = arith.subf %341, %350 : vector<8x32xf32>
    %352 = arith.mulf %351, %351 : vector<8x32xf32>
    %cst_155 = arith.constant dense<0.000000e+00> : vector<8xf32>
    %353 = vector.multi_reduction <add>, %352, %cst_155 [1] : vector<8x32xf32> to vector<8xf32>
    %354 = vector.shape_cast %353 : vector<8xf32> to vector<8x1xf32>
    %cst_156 = arith.constant 3.200000e+01 : f32
    %355 = vector.broadcast %cst_156 : f32 to vector<8x1xf32>
    %356 = arith.divf %354, %355 : vector<8x1xf32>
    %357 = vector.broadcast %349 : vector<8x1xf32> to vector<8x32xf32>
    %358 = arith.subf %341, %357 : vector<8x32xf32>
    %cst_157 = arith.constant 9.99999996E-13 : f32
    %359 = vector.broadcast %cst_157 : f32 to vector<8x1xf32>
    %360 = arith.addf %356, %359 : vector<8x1xf32>
    %361 = math.rsqrt %360 : vector<8x1xf32>
    %362 = vector.broadcast %361 : vector<8x1xf32> to vector<8x32xf32>
    %363 = arith.mulf %358, %362 : vector<8x32xf32>
    %364 = vector.broadcast %343 : vector<1x32xf32> to vector<8x32xf32>
    %365 = arith.mulf %363, %364 : vector<8x32xf32>
    %366 = vector.broadcast %345 : vector<1x32xf32> to vector<8x32xf32>
    %367 = arith.addf %365, %366 : vector<8x32xf32>
    %c0_158 = arith.constant 0 : index
    %c0_159 = arith.constant 0 : index
    %368 = vector.load %arg17[%c0_158, %c0_159] : memref<32x32xbf16, #tpu.memory_space<vmem>>, vector<32x32xbf16>
    %c0_160 = arith.constant 0 : index
    %c0_161 = arith.constant 0 : index
    %369 = vector.load %arg18[%c0_160, %c0_161] : memref<1x32xf32, #tpu.memory_space<vmem>>, vector<1x32xf32>
    %370 = arith.truncf %367 : vector<8x32xf32> to vector<8x32xbf16>
    %cst_162 = arith.constant dense<0.000000e+00> : vector<8x32xf32>
    %371 = tpu.matmul %370, %368, %cst_162 {dimension_numbers = #tpu.dot_dimension_numbers<[1], [0], [0], [1], [0, 0, 1, 1], [], []>} : vector<8x32xbf16>, vector<32x32xbf16>, vector<8x32xf32> -> vector<8x32xf32>
    %372 = vector.broadcast %369 : vector<1x32xf32> to vector<8x32xf32>
    %373 = arith.addf %371, %372 : vector<8x32xf32>
    %cst_163 = arith.constant 5.000000e-01 : f32
    %374 = vector.broadcast %cst_163 : f32 to vector<8x32xf32>
    %375 = arith.mulf %374, %373 : vector<8x32xf32>
    %cst_164 = arith.constant 0.707106769 : f32
    %376 = vector.broadcast %cst_164 : f32 to vector<8x32xf32>
    %377 = arith.mulf %373, %376 : vector<8x32xf32>
    %378 = math.erf %377 : vector<8x32xf32>
    %cst_165 = arith.constant 1.000000e+00 : f32
    %379 = vector.broadcast %cst_165 : f32 to vector<8x32xf32>
    %380 = arith.addf %379, %378 : vector<8x32xf32>
    %381 = arith.mulf %375, %380 : vector<8x32xf32>
    %c0_166 = arith.constant 0 : index
    %c0_167 = arith.constant 0 : index
    %382 = vector.load %arg19[%c0_166, %c0_167] : memref<1x32xf32, #tpu.memory_space<vmem>>, vector<1x32xf32>
    %c0_168 = arith.constant 0 : index
    %c0_169 = arith.constant 0 : index
    %383 = vector.load %arg20[%c0_168, %c0_169] : memref<1x32xf32, #tpu.memory_space<vmem>>, vector<1x32xf32>
    %cst_170 = arith.constant dense<0.000000e+00> : vector<8xf32>
    %384 = vector.multi_reduction <add>, %381, %cst_170 [1] : vector<8x32xf32> to vector<8xf32>
    %385 = vector.shape_cast %384 : vector<8xf32> to vector<8x1xf32>
    %cst_171 = arith.constant 3.200000e+01 : f32
    %386 = vector.broadcast %cst_171 : f32 to vector<8x1xf32>
    %387 = arith.divf %385, %386 : vector<8x1xf32>
    %388 = vector.broadcast %387 : vector<8x1xf32> to vector<8x32xf32>
    %389 = arith.subf %381, %388 : vector<8x32xf32>
    %390 = arith.mulf %389, %389 : vector<8x32xf32>
    %cst_172 = arith.constant dense<0.000000e+00> : vector<8xf32>
    %391 = vector.multi_reduction <add>, %390, %cst_172 [1] : vector<8x32xf32> to vector<8xf32>
    %392 = vector.shape_cast %391 : vector<8xf32> to vector<8x1xf32>
    %cst_173 = arith.constant 3.200000e+01 : f32
    %393 = vector.broadcast %cst_173 : f32 to vector<8x1xf32>
    %394 = arith.divf %392, %393 : vector<8x1xf32>
    %395 = vector.broadcast %387 : vector<8x1xf32> to vector<8x32xf32>
    %396 = arith.subf %381, %395 : vector<8x32xf32>
    %cst_174 = arith.constant 9.99999996E-13 : f32
    %397 = vector.broadcast %cst_174 : f32 to vector<8x1xf32>
    %398 = arith.addf %394, %397 : vector<8x1xf32>
    %399 = math.rsqrt %398 : vector<8x1xf32>
    %400 = vector.broadcast %399 : vector<8x1xf32> to vector<8x32xf32>
    %401 = arith.mulf %396, %400 : vector<8x32xf32>
    %402 = vector.broadcast %382 : vector<1x32xf32> to vector<8x32xf32>
    %403 = arith.mulf %401, %402 : vector<8x32xf32>
    %404 = vector.broadcast %383 : vector<1x32xf32> to vector<8x32xf32>
    %405 = arith.addf %403, %404 : vector<8x32xf32>
    %406 = arith.truncf %405 : vector<8x32xf32> to vector<8x32xbf16>
    %c0_175 = arith.constant 0 : index
    %c0_176 = arith.constant 0 : index
    %407 = vector.load %arg21[%c0_175, %c0_176] : memref<128x32xbf16, #tpu.memory_space<vmem>>, vector<128x32xbf16>
    %cst_177 = arith.constant dense<0.000000e+00> : vector<8x128xf32>
    %408 = tpu.matmul %406, %407, %cst_177 {dimension_numbers = #tpu.dot_dimension_numbers<[1], [1], [0], [0], [0, 0, 1, 0], [], []>} : vector<8x32xbf16>, vector<128x32xbf16>, vector<8x128xf32> -> vector<8x128xf32>
    %c0_178 = arith.constant 0 : index
    %c0_179 = arith.constant 0 : index
    %409 = vector.load %arg22[%c0_178, %c0_179] : memref<1x128xf32, #tpu.memory_space<vmem>>, vector<1x128xf32>
    %410 = vector.broadcast %409 : vector<1x128xf32> to vector<8x128xf32>
    %411 = arith.addf %408, %410 : vector<8x128xf32>
    %c0_180 = arith.constant 0 : index
    %c0_181 = arith.constant 0 : index
    %c0_182 = arith.constant 0 : index
    %412 = vector.load %arg23[%c0_180, %c0_181, %c0_182] : memref<1x8x128xf32, #tpu.memory_space<vmem>>, vector<1x8x128xf32>
    %413 = vector.shape_cast %412 : vector<1x8x128xf32> to vector<8x128xf32>
    %414 = vector.shape_cast %411 : vector<8x128xf32> to vector<1x8x128xf32>
    tpu.vector_store %arg23[%c0_180, %c0_181, %c0_182], %414 {strides = array<i32>} : memref<1x8x128xf32, #tpu.memory_space<vmem>>, vector<1x8x128xf32>,
    return
  }
  func.func @transform_0(%arg0: i32) -> (i32, i32, i32) {
    %c0_i32 = arith.constant 0 : i32
    %c0_i32_0 = arith.constant 0 : i32
    %c0_i32_1 = arith.constant 0 : i32
    return %arg0, %c0_i32, %c0_i32_0 : i32, i32, i32
  }
  func.func @transform_1(%arg0: i32) -> (i32, i32, i32) {
    %c0_i32 = arith.constant 0 : i32
    %c0_i32_0 = arith.constant 0 : i32
    %c0_i32_1 = arith.constant 0 : i32
    return %arg0, %c0_i32, %c0_i32_0 : i32, i32, i32
  }
  func.func @transform_2(%arg0: i32) -> (i32, i32) {
    %c0_i32 = arith.constant 0 : i32
    %c0_i32_0 = arith.constant 0 : i32
    %c0_i32_1 = arith.constant 0 : i32
    return %c0_i32, %c0_i32_0 : i32, i32
  }
  func.func @transform_3(%arg0: i32) -> (i32, i32) {
    %c0_i32 = arith.constant 0 : i32
    %c0_i32_0 = arith.constant 0 : i32
    %c0_i32_1 = arith.constant 0 : i32
    return %c0_i32, %c0_i32_0 : i32, i32
  }
  func.func @transform_4(%arg0: i32) -> (i32, i32, i32) {
    %c0_i32 = arith.constant 0 : i32
    %c0_i32_0 = arith.constant 0 : i32
    %c0_i32_1 = arith.constant 0 : i32
    %c0_i32_2 = arith.constant 0 : i32
    return %c0_i32, %c0_i32_0, %c0_i32_1 : i32, i32, i32
  }
  func.func @transform_5(%arg0: i32) -> (i32, i32, i32) {
    %c0_i32 = arith.constant 0 : i32
    %c0_i32_0 = arith.constant 0 : i32
    %c0_i32_1 = arith.constant 0 : i32
    %c0_i32_2 = arith.constant 0 : i32
    return %c0_i32, %c0_i32_0, %c0_i32_1 : i32, i32, i32
  }
  func.func @transform_6(%arg0: i32) -> (i32, i32, i32) {
    %c0_i32 = arith.constant 0 : i32
    %c0_i32_0 = arith.constant 0 : i32
    %c0_i32_1 = arith.constant 0 : i32
    %c0_i32_2 = arith.constant 0 : i32
    return %c0_i32, %c0_i32_0, %c0_i32_1 : i32, i32, i32
  }
  func.func @transform_7(%arg0: i32) -> (i32, i32, i32) {
    %c0_i32 = arith.constant 0 : i32
    %c0_i32_0 = arith.constant 0 : i32
    %c0_i32_1 = arith.constant 0 : i32
    %c0_i32_2 = arith.constant 0 : i32
    return %c0_i32, %c0_i32_0, %c0_i32_1 : i32, i32, i32
  }
  func.func @transform_8(%arg0: i32) -> (i32, i32, i32) {
    %c0_i32 = arith.constant 0 : i32
    %c0_i32_0 = arith.constant 0 : i32
    %c0_i32_1 = arith.constant 0 : i32
    %c0_i32_2 = arith.constant 0 : i32
    return %c0_i32, %c0_i32_0, %c0_i32_1 : i32, i32, i32
  }
  func.func @transform_9(%arg0: i32) -> (i32, i32, i32) {
    %c0_i32 = arith.constant 0 : i32
    %c0_i32_0 = arith.constant 0 : i32
    %c0_i32_1 = arith.constant 0 : i32
    %c0_i32_2 = arith.constant 0 : i32
    return %c0_i32, %c0_i32_0, %c0_i32_1 : i32, i32, i32
  }
  func.func @transform_10(%arg0: i32) -> (i32, i32, i32) {
    %c0_i32 = arith.constant 0 : i32
    %c0_i32_0 = arith.constant 0 : i32
    %c0_i32_1 = arith.constant 0 : i32
    %c0_i32_2 = arith.constant 0 : i32
    return %c0_i32, %c0_i32_0, %c0_i32_1 : i32, i32, i32
  }
  func.func @transform_11(%arg0: i32) -> (i32, i32, i32) {
    %c0_i32 = arith.constant 0 : i32
    %c0_i32_0 = arith.constant 0 : i32
    %c0_i32_1 = arith.constant 0 : i32
    %c0_i32_2 = arith.constant 0 : i32
    return %c0_i32, %c0_i32_0, %c0_i32_1 : i32, i32, i32
  }
  func.func @transform_12(%arg0: i32) -> (i32, i32, i32) {
    %c0_i32 = arith.constant 0 : i32
    %c0_i32_0 = arith.constant 0 : i32
    %c0_i32_1 = arith.constant 0 : i32
    %c0_i32_2 = arith.constant 0 : i32
    return %c0_i32, %c0_i32_0, %c0_i32_1 : i32, i32, i32
  }
  func.func @transform_13(%arg0: i32) -> (i32, i32, i32) {
    %c0_i32 = arith.constant 0 : i32
    %c0_i32_0 = arith.constant 0 : i32
    %c0_i32_1 = arith.constant 0 : i32
    %c0_i32_2 = arith.constant 0 : i32
    return %c0_i32, %c0_i32_0, %c0_i32_1 : i32, i32, i32
  }
  func.func @transform_14(%arg0: i32) -> (i32, i32, i32) {
    %c0_i32 = arith.constant 0 : i32
    %c0_i32_0 = arith.constant 0 : i32
    %c0_i32_1 = arith.constant 0 : i32
    %c0_i32_2 = arith.constant 0 : i32
    return %c0_i32, %c0_i32_0, %c0_i32_1 : i32, i32, i32
  }
  func.func @transform_15(%arg0: i32) -> (i32, i32, i32) {
    %c0_i32 = arith.constant 0 : i32
    %c0_i32_0 = arith.constant 0 : i32
    %c0_i32_1 = arith.constant 0 : i32
    %c0_i32_2 = arith.constant 0 : i32
    return %c0_i32, %c0_i32_0, %c0_i32_1 : i32, i32, i32
  }
  func.func @transform_16(%arg0: i32) -> (i32, i32) {
    %c0_i32 = arith.constant 0 : i32
    %c0_i32_0 = arith.constant 0 : i32
    %c0_i32_1 = arith.constant 0 : i32
    return %c0_i32, %c0_i32_0 : i32, i32
  }
  func.func @transform_17(%arg0: i32) -> (i32, i32) {
    %c0_i32 = arith.constant 0 : i32
    %c0_i32_0 = arith.constant 0 : i32
    %c0_i32_1 = arith.constant 0 : i32
    return %c0_i32, %c0_i32_0 : i32, i32
  }
  func.func @transform_18(%arg0: i32) -> (i32, i32) {
    %c0_i32 = arith.constant 0 : i32
    %c0_i32_0 = arith.constant 0 : i32
    %c0_i32_1 = arith.constant 0 : i32
    return %c0_i32, %c0_i32_0 : i32, i32
  }
  func.func @transform_19(%arg0: i32) -> (i32, i32) {
    %c0_i32 = arith.constant 0 : i32
    %c0_i32_0 = arith.constant 0 : i32
    %c0_i32_1 = arith.constant 0 : i32
    return %c0_i32, %c0_i32_0 : i32, i32
  }
  func.func @transform_20(%arg0: i32) -> (i32, i32) {
    %c0_i32 = arith.constant 0 : i32
    %c0_i32_0 = arith.constant 0 : i32
    %c0_i32_1 = arith.constant 0 : i32
    return %c0_i32, %c0_i32_0 : i32, i32
  }
  func.func @transform_21(%arg0: i32) -> (i32, i32) {
    %c0_i32 = arith.constant 0 : i32
    %c0_i32_0 = arith.constant 0 : i32
    %c0_i32_1 = arith.constant 0 : i32
    return %c0_i32, %c0_i32_0 : i32, i32
  }
  func.func @transform_22(%arg0: i32) -> (i32, i32, i32) {
    %c0_i32 = arith.constant 0 : i32
    %c0_i32_0 = arith.constant 0 : i32
    %c0_i32_1 = arith.constant 0 : i32
    return %arg0, %c0_i32, %c0_i32_0 : i32, i32, i32
  }
}

</mosaic_0001>

<bundles_post_ra>
// kernel: bert_mlm_forward.3
= control target key start
LH: loop header
LB: loop body
LE: loop exit
PB: predicated region body
PF: predicated region fallthrough
CT: control target
= control target key end

     0   :  { %9 = vsyncpa [#allocation3], 0  ;;  %v197_v2 = vmov 0   ;;  %s263_s0 = inlined_call_operand.vmem [shape: s32[16,1], index: 0, kind: input, shape index: {}]   ;;  %s264_s1 = inlined_call_operand.vmem [shape: f32[16,128], index: 1, kind: input, shape index: {}]   ;;  %s265_s2 = inlined_call_operand.hbm [shape: f32[1,1], index: 2, kind: output, shape index: {0}]   ;;  %s266_s3 = inlined_call_operand.hbm [shape: f32[1,1], index: 3, kind: output, shape index: {1}]  }
   0x1   :  { %v15_v0 = vld [vmem:[%s264_s1] sm:$0xff]  ;;  %139 = vset.pattern.permute.xlu1 %v197_v2 }
   0x2   :  { %v17_v1 = vld [vmem:[%s263_s0] sm:$0xff]  ;;  %19 = vmax.xlane.f32.xlu0 %v15_v0 }
   0x3   :  { %10 = vsyncpa [#allocation5], 0  ;;  %v16_v3 = vld [vmem:[%s264_s1 + $0x8] sm:$0xff]  ;;  %42 = vperm.xlu1 %139, %v17_v1   ;;  %140 = vset.pattern.permute.xlu0 %v197_v2  ;;  %v39_v7 = vlaneseq  ;;  %v198_v15 = vmov 0.0   ;;  %vm59_vm2 = vcmp.ne.s32.totalorder %v17_v1, 4294967196  ;;  %vm69_vm4 = vcmask 7168  }
   0x4   :  { %v18_v4 = vld [vmem:[%s263_s0 + $0x8] sm:$0xff]  ;;  %v129_v22 = vsel %vm59_vm2, 1.0, %v198_v15  ;;  %s199_s0 = smov [#allocation2]   ;;  %vm83_vm5 = vcmask 0   ;;  %s200_s21 = smov [#allocation4]  }
   0x5   :  { %v40_v12 = vand.u32 127, %v39_v7  ;;  %vm60_vm3 = vcmp.ne.s32.totalorder %v18_v4, 4294967196  ;;  %v85_v24 = vsel %vm69_vm4, %v129_v22, 0.0  ;;  %s105_s1 = sshll.u32 %s199_s0, 4  ;;  %s115_s22 = sshll.u32 %s200_s21, 4  ;;  %s106_s1 = int_to_ptr.vmem [resolvable:$true] %s105_s1  ;;  %s116_s22 = int_to_ptr.vmem [resolvable:$true] %s115_s22 }
   0x6   :  { %21 = vmax.xlane.f32.xlu0 %v16_v3  ;;  %v130_v23 = vsel %vm60_vm3, 1.0, %v198_v15  ;;  %s149_s23 = scalar_lea.vmem %s106_s1, 16  ;;  %s153_s24 = scalar_lea.vmem %s106_s1, 32 }
   0x7   :  { %45 = vperm.xlu1 %139, %v18_v4   ;;  %v86_v25 = vsel %vm69_vm4, %v130_v23, 0.0  ;;  %p150_p0 = scmp.ne.s32.totalorder %s106_s1, %s149_s23  ;;  %p154_p1 = scmp.lt.s32.totalorder %s106_s1, %s106_s1 }
   0x8   :  { %v87_v26 = vadd.f32 %v86_v25, %v85_v24  ;;  %p155_p2 = scmp.lt.s32.totalorder %s153_s24, %s149_s23 }
   0xa   :  { %p156_p3 = por %p155_p2, %p154_p1 }
   0xc   :  { %p157_p4 = pnand %p156_p3, %p150_p0 }
  0x82   :  { %v43_v11 = vpop.permute.xlu1 %42 }
  0x83   :  { %vm47_vm0 = vcmp.eq.s32.totalorder %v40_v12, %v43_v11 }
  0x84   :  { %v127_v16 = vsel %vm47_vm0, 1.0, %v198_v15 }
  0x85   :  { %v53_v18 = vmul.f32 %v127_v16, %v15_v0 }
  0x86   :  { %v46_v14 = vpop.permute.xlu1 %45 }
  0x87   :  { %vm48_vm1 = vcmp.eq.s32.totalorder %v40_v12, %v46_v14 }
  0x88   :  { %v128_v19 = vsel %vm48_vm1, 1.0, %v198_v15 }
  0x89   :  { %v54_v21 = vmul.f32 %v128_v19, %v16_v3 }
  0x8f   :  { %v20_v5 = vpop.xlane.xlu0 %19 }
  0x90   :  { %v23_v6 = vsub.f32 %v15_v0, %v20_v5 }
  0x92   :  { %v25_v8 = vmul.f32 1.442695, %v23_v6 }
  0x93   :  { %v22_v9 = vpop.xlane.xlu0 %21 }
  0x94   :  { %141 = vpow2.f32 %v25_v8  ;;  %v24_v10 = vsub.f32 %v16_v3, %v22_v9 }
  0x96   :  { %v27_v13 = vmul.f32 1.442695, %v24_v10 }
  0x98   :  { %143 = vpow2.f32 %v27_v13 }
  0x9e   :  { %v142_v17 = vpop.eup %141 }
  0x9f   :  { %29 = vadd.xlane.f32.xlu0 %v142_v17 }
  0xa2   :  { %v144_v20 = vpop.eup %143 }
  0xa3   :  { %31 = vadd.xlane.f32.xlu1 %v144_v20  ;;  %55 = vadd.xlane.f32.xlu0 %v53_v18 }
  0xa7   :  { %57 = vadd.xlane.f32.xlu0 %v54_v21 }
 0x12c   :  { %v30_v27 = vpop.xlane.xlu0 %29 }
 0x12d   :  { %145 = vlog2.f32 %v30_v27 }
 0x130   :  { %v32_v28 = vpop.xlane.xlu1 %31  ;;  %v56_v31 = vpop.xlane.xlu0 %55 }
 0x131   :  { %147 = vlog2.f32 %v32_v28 }
 0x134   :  { %v58_v37 = vpop.xlane.xlu0 %57 }
 0x137   :  { %v146_v29 = vpop.eup %145 }
 0x138   :  { %v34_v30 = vmul.f32 0.6931472, %v146_v29 }
 0x13a   :  { %v37_v32 = vadd.f32 %v34_v30, %v20_v5 }
 0x13b   :  { %v148_v33 = vpop.eup %147 }
 0x13c   :  { %v36_v34 = vmul.f32 0.6931472, %v148_v33  ;;  %v65_v35 = vsub.f32 %v37_v32, %v56_v31 }
 0x13e   :  { %v38_v36 = vadd.f32 %v36_v34, %v22_v9  ;;  %v67_v38 = vmul.f32 %v129_v22, %v65_v35 }
 0x140   :  { %v66_v39 = vsub.f32 %v38_v36, %v58_v37  ;;  %v70_v41 = vsel %vm69_vm4, %v67_v38, 0.0 }
 0x142   :  { %v68_v40 = vmul.f32 %v130_v23, %v66_v39 }
 0x144   :  { %v71_v42 = vsel %vm69_vm4, %v68_v40, 0.0 }
 0x145   :  { %v72_v43 = vadd.f32 %v71_v42, %v70_v41 }
 0x147   :  { %73 = vadd.xlane.f32.xlu0 %v72_v43 }
 0x14b   :  { %88 = vadd.xlane.f32.xlu0 %v87_v26 }
 0x1d4   :  { %v74_v44 = vpop.xlane.xlu0 %73 }
 0x1d5   :  { %v75_v45 = vrot.slane %v74_v44, 4 }
 0x1d7   :  { %v76_v46 = vadd.f32 %v75_v45, %v74_v44 }
 0x1d8   :  { %v89_v47 = vpop.xlane.xlu0 %88 }
 0x1d9   :  { %v77_v48 = vrot.slane %v76_v46, 2  ;;  %v90_v49 = vrot.slane %v89_v47, 4 }
 0x1db   :  { %v91_v50 = vadd.f32 %v90_v49, %v89_v47  ;;  %v78_v51 = vadd.f32 %v77_v48, %v76_v46 }
 0x1dd   :  { %v92_v52 = vrot.slane %v91_v50, 2  ;;  %v79_v53 = vrot.slane %v78_v51, 1 }
 0x1df   :  { %v93_v54 = vadd.f32 %v92_v52, %v91_v50  ;;  %v80_v55 = vadd.f32 %v79_v53, %v78_v51 }
 0x1e1   :  { %131 = vpush %v80_v55  ;;  %v94_v56 = vrot.slane %v93_v54, 1 }
 0x1e3   :  { %v95_v57 = vadd.f32 %v94_v56, %v93_v54 }
 0x1e5   :  { %133 = vpush %v95_v57 }
 0x212   :  { %s132_s20 = spop %131 }
 0x213   :  { %v82_v58 = vstv %s132_s20 }
 0x214   :  { %84 = vst.msk [vmem:[#allocation2] sm:$0x1] %vm83_vm5, %v82_v58 }
 0x215   :  { %160 = shalt.err (!%p157_p4)
}
 0x216   :  { %s161_s27 = scalar_lea.hbm %s265_s2, 16 }
 0x217   :  { %p162_p5 = scmp.ne.s32.totalorder %s265_s2, %s161_s27  ;;  %p165_p6 = scmp.lt.u32.totalorder %s161_s27, %s265_s2 }
 0x219   :  { %p167_p7 = pnand %p165_p6, %p162_p5 }
 0x21b   :  { %170 = shalt.err (!%p167_p7)
}
 0x21c   :  { %108 = dma.vmem_to_hbm [thread:$0]  %s106_s1, 16, %s265_s2, [#allocation3]  }
 0x21d   :  { %s134_s7 = spop %133  ;;  %s171_s8 = scalar_lea.vmem %s116_s22, 16 }
 0x21e   :  { %v97_v59 = vstv %s134_s7  ;;  %p172_p8 = scmp.ne.s32.totalorder %s116_s22, %s171_s8  ;;  %s175_s9 = scalar_lea.vmem %s116_s22, 32 }
 0x21f   :  { %98 = vst.msk [vmem:[#allocation4] sm:$0x1] %vm83_vm5, %v97_v59  ;;  %p176_p9 = scmp.lt.s32.totalorder %s116_s22, %s116_s22  ;;  %p177_p10 = scmp.lt.s32.totalorder %s175_s9, %s171_s8 }
 0x221   :  { %p178_p11 = por %p177_p10, %p176_p9 }
 0x223   :  { %p179_p12 = pnand %p178_p11, %p172_p8 }
 0x225   :  { %182 = shalt.err (!%p179_p12)
}
 0x226   :  { %s183_s12 = scalar_lea.hbm %s266_s3, 16 }
 0x227   :  { %p184_p13 = scmp.ne.s32.totalorder %s266_s3, %s183_s12  ;;  %p187_p0 = scmp.lt.u32.totalorder %s183_s12, %s266_s3 }
 0x229   :  { %p189_p1 = pnand %p187_p0, %p184_p13 }
 0x22b   :  { %192 = shalt.err (!%p189_p1)
}
 0x22c   :  { %118 = dma.vmem_to_hbm [thread:$0]  %s116_s22, 16, %s266_s3, [#allocation5]  }
 0x22d   :  { %193 = dma.done.wait [#allocation3], 16  }
 0x22e   :  { %194 = vsyncadd [#allocation3], 4294967280 }
 0x22f   :  { %195 = dma.done.wait [#allocation5], 16  }
 0x230   :  { %196 = vsyncadd [#allocation5], 4294967280 }
 0x231   :  { %125 = vsyncpa [#allocation3], 1 }
 0x232   :  { %126 = vsyncpa [#allocation5], 1 }

// kernel: bert_mlm_forward.2
= control target key start
LH: loop header
LB: loop body
LE: loop exit
PB: predicated region body
PF: predicated region fallthrough
CT: control target
= control target key end

     0   :  { %s4162_s0 = inlined_call_operand.vmem [shape: f32[2,8,32], index: 0, kind: input, shape index: {}]   ;;  %s4163_s1 = inlined_call_operand.vmem [shape: f32[2,1,8], index: 1, kind: input, shape index: {}]   ;;  %s4164_s2 = inlined_call_operand.vmem [shape: f32[1,32], index: 2, kind: input, shape index: {}]   ;;  %s4165_s3 = inlined_call_operand.vmem [shape: f32[1,32], index: 3, kind: input, shape index: {}]   ;;  %s4166_s4 = inlined_call_operand.vmem [shape: bf16[2,32,96], index: 4, kind: input, shape index: {}]   ;;  %s4167_s5 = inlined_call_operand.vmem [shape: f32[2,1,96], index: 5, kind: input, shape index: {}]   ;;  %s4168_s6 = inlined_call_operand.vmem [shape: bf16[2,32,32], index: 6, kind: input, shape index: {}]   ;;  %s4169_s7 = inlined_call_operand.vmem [shape: f32[2,1,32], index: 7, kind: input, shape index: {}]   ;;  %s4170_s8 = inlined_call_operand.vmem [shape: f32[2,1,32], index: 8, kind: input, shape index: {}]   ;;  %s4171_s9 = inlined_call_operand.vmem [shape: f32[2,1,32], index: 9, kind: input, shape index: {}]   ;;  %s4172_s10 = inlined_call_operand.vmem [shape: bf16[2,32,64], index: 10, kind: input, shape index: {}]   ;;  %s4173_s11 = inlined_call_operand.vmem [shape: f32[2,1,64], index: 11, kind: input, shape index: {}]   ;;  %s4174_s12 = inlined_call_operand.vmem [shape: bf16[2,64,32], index: 12, kind: input, shape index: {}]   ;;  %s4175_s13 = inlined_call_operand.vmem [shape: f32[2,1,32], index: 13, kind: input, shape index: {}]   ;;  %s4176_s14 = inlined_call_operand.vmem [shape: f32[2,1,32], index: 14, kind: input, shape index: {}]   ;;  %s4177_s15 = inlined_call_operand.vmem [shape: f32[2,1,32], index: 15, kind: input, shape index: {}]   ;;  %s4178_s16 = inlined_call_operand.vmem [shape: bf16[32,32], index: 16, kind: input, shape index: {}]   ;;  %s4179_s17 = inlined_call_operand.vmem [shape: f32[1,32], index: 17, kind: input, shape index: {}]   ;;  %s4180_s18 = inlined_call_operand.vmem [shape: f32[1,32], index: 18, kind: input, shape index: {}]   ;;  %s4181_s19 = inlined_call_operand.vmem [shape: f32[1,32], index: 19, kind: input, shape index: {}]   ;;  %s4182_s20 = inlined_call_operand.vmem [shape: bf16[128,32], index: 20, kind: input, shape index: {}]   ;;  %s4183_s21 = inlined_call_operand.vmem [shape: f32[1,128], index: 21, kind: input, shape index: {}]   ;;  %s4184_s22 = inlined_call_operand.vmem [shape: f32[2,8,128], index: 22, kind: output, shape index: {}]  }
   0x1   :  { %4200 = sst [smem:[#allocation2_spill]] %s4162_s0 }
   0x2   :  { %4201 = sst [smem:[#allocation3_spill]] %s4163_s1 }
   0x3   :  { %4202 = sst [smem:[#allocation4_spill]] %s4164_s2 }
   0x4   :  { %4203 = sst [smem:[#allocation5_spill]] %s4165_s3  ;;  %s3725_s3 = smov 0  }
   0x5   :  { %4204 = sst [smem:[#allocation6_spill]] %s4166_s4 }
   0x6   :  { %4205 = sst [smem:[#allocation7_spill]] %s4167_s5 }
   0x7   :  { %4206 = sst [smem:[#allocation8_spill]] %s4168_s6 }
   0x8 LB: > { %s3106_s28 = sadd.s32 4294967295, %s3592_s3   ;;  %p3110_p0 = scmp.ge.s32.totalorder %s3592_s3, 1  ;;  %s3592_s3 = sphi %s3725_s3, %s32_s3  }
   0x9   : > { %p619_p1 = scmp.lt.s32.totalorder %s3592_s3, 3 }
   0xb   : > { %p620_p2 = pnand %p3110_p0, %p619_p1 }
   0xc   : > { %p682_p3 = scmp.lt.s32.totalorder (!%p620_p2), %s3106_s28, 1  ;;  %vm697_vm0 = vcmask (!%p620_p2), 261120   ;;  %s4207_s0 = sld [smem:[#allocation2_spill]] (!%p620_p2)  ;;  %v3594_v8 = vmov (!%p620_p2), 0.0   ;;  %vm3595_vm1 = vmmov (!%p620_p2), 0   ;;  %vm797_vm2 = vcmask (!%p620_p2), 64512  }
   0xd   : > { %623 = sbr.rel (%p620_p2) target bundleno = 6628 (0x19e4), region = 108  ;;  %s4208_s24 = sld [smem:[#allocation6_spill]] (!%p620_p2)  ;;  %3302 = vmatprep.subr.bf16.mxu1 (!%p620_p2), %v3594_v8  ;;  %3325 = vmatprep.subr.mxu0 (!%p620_p2), %v3594_v8  ;;  %vm1481_vm3 = vcmask (!%p620_p2), 130048   ;;  %vm1483_vm4 = vcmask (!%p620_p2), 195584   ;;  %vm1694_vm5 = vcmask (!%p620_p2), 523264  }
   0xe   : > { %3306 = vmatprep.mubr.msk.bf16.mxu1 (!%p620_p2), %vm3595_vm1, %v3594_v8  ;;  %3327 = vmatprep.mubr.msk.f32.mxu0 (!%p620_p2), %vm3595_vm1, %v3594_v8  ;;  %s4209_s27 = sld [smem:[#allocation4_spill]] (!%p620_p2)  ;;  %s4211_s5 = sld [smem:[#allocation7_spill]] (!%p620_p2) }
   0xf   : > { %s4192_s6 = smov (!%p620_p2), 64   ;;  %s3597_s25 = smov (!%p620_p2), 96  }
  0x10   : > { %s3598_s26 = smov (!%p620_p2), 88   ;;  %s3599_s2 = smov (!%p620_p2), 120  }
  0x11   : > { %s4212_s4 = sld [smem:[#allocation3_spill]] (!%p620_p2)  ;;  %s4199_s1 = smov (!%p620_p2), 112  }
  0x12   : > { %s4194_s30 = smov (!%p620_p2), 104  }
  0x13   : > { %v3506_v7 = vld [vmem:[%s4208_s24] sm:$0xff] (!%p620_p2)   ;;  %v3507_v9 = vld [vmem:[%s4208_s24 + $0x8] sm:$0xff] (!%p620_p2)  }
  0x14   : > { %s4227_s28 = smov (!%p682_p3, %s3106_s28), 1  ;;  %3303 = vmatpush3.bf16.msra.mxu1 %v3506_v7  ;;  %v3113_v14 = vld [vmem:[%s4209_s27] ss:$0 sm:$0xff]  ;;  %s4193_s27 = smov 72  }
  0x15   : > { %s4188_s29 = sshll.u32 %s4227_s28, 3  ;;  %3304 = vmatprep.subr.bf16.mxu1 %v3594_v8  ;;  %v3115_v20 = vld [vmem:[%s4211_s5] ss:$0 sm:$0xff] }
  0x16   : > { %s685_s23 = scalar_lea.vmem %s4207_s0, %s4188_s29  ;;  %s4210_s0 = sld [smem:[#allocation5_spill]] }
  0x17   : > { %v694_v0 = vld [vmem:[%s685_s23] sm:$0xff]  ;;  %s4195_s23 = smov 80   ;;  %s4189_s29 = smov 56  }
  0x18   : > { %v698_v1 = vsel %vm697_vm0, %v694_v0, 0.0  ;;  %3305 = vmatpush3.bf16.msra.mxu1 %v3507_v9 }
  0x19   : > { %699 = vadd.xlane.f32.xlu0 %v698_v1  ;;  %3310 = vmatprep.subr.mxu1 %v3594_v8 }
  0x1c   : > { %v3114_v16 = vld [vmem:[%s4210_s0] ss:$0 sm:$0xff]  ;;  %s688_s0 = scalar_lea.vmem %s4212_s4, %s4227_s28  ;;  %s4191_s4 = smov 48  }
  0x1d   : > { %v3794_v28 = vld [vmem:[%s688_s0] ss:$0 sm:$0xff]  ;;  %s4190_s0 = smov 40  }
  0xa6   : > { %v700_v2 = vpop.xlane.xlu0 %699 }
  0xa7   : > { %v702_v3 = vmul.f32 0.03125, %v700_v2 }
  0xa9   : > { %v703_v4 = vsub.f32 %v694_v0, %v702_v3 }
  0xab   : > { %v704_v5 = vmul.f32 %v703_v4, %v703_v4 }
  0xad   : > { %v705_v6 = vsel %vm697_vm0, %v704_v5, 0.0 }
  0xae   : > { %706 = vadd.xlane.f32.xlu0 %v705_v6 }
 0x13b   : > { %v707_v10 = vpop.xlane.xlu0 %706 }
 0x13c   : > { %v708_v11 = vmul.f32 0.03125, %v707_v10 }
 0x13e   : > { %v709_v12 = vadd.f32 1e-12, %v708_v11 }
 0x140   : > { %3536 = vrsqrt.f32 %v709_v12 }
 0x14a   : > { %v3537_v13 = vpop.eup %3536 }
 0x14b   : > { %v711_v15 = vmul.f32 %v3537_v13, %v703_v4 }
 0x14d   : > { %v718_v17 = vmul.f32 %v3113_v14, %v711_v15 }
 0x14f   : > { %v3763_v18 = vadd.f32 %v3114_v16, %v718_v17 }
 0x151   : > { %v732_v19 = vpack.c.bf16 %v3763_v18, %v3763_v18 }
 0x153   : > { %3307 = vmatmul.mubr.msk.bf16.vlgmr.msra.gmra.mrb[0].mxu1 %vm697_vm0, %v732_v19 }
 0x154   : > { %3312 = vmatprep.mubr.msk.f32.mxu1 %vm3595_vm1, %v3594_v8 }
 0x226   : > { %v788_v21 = vpop.f32.mrb[0].mxu1 }
 0x227   : > { %v3773_v22 = vadd.f32 %v3115_v20, %v788_v21  ;;  %v3308_v23 = vpop.f32.mrb[1].mxu1 }
 0x228   : > { %v791_v24 = vpop.f32.mrb[2].mxu1 }
 0x229   : > { %891 = vrot.lane.b32.xlu0 %v3773_v22, %s4192_s6  ;;  %795 = vrot.lane.b32.xlu1 %v3773_v22, %s3597_s25  ;;  %v3309_v25 = vpop.f32.mrb[3].mxu1 }
 0x22d   : > { %969 = vrot.lane.b32.xlu0 %v3773_v22, %s3598_s26 }
 0x231   : > { %967 = vrot.lane.b32.xlu0 %v3773_v22, %s3599_s2 }
 0x29b   : > { %v796_v26 = vpop.permute.xlu1 %795  ;;  %v892_v27 = vpop.permute.xlu0 %891 }
 0x29c   : > { %3311 = vmatpush3.xpose.msk.msra.mxu1 %vm797_vm2, %v796_v26 }
 0x29d   : > { %3315 = vmatprep.subr.mxu1 %v3594_v8 }
 0x29f   : > { %3313 = vmatmul.mubr.msk.f32.vlgmr.msra.gmra.mrb[4].mxu1 %vm797_vm2, %v3773_v22  ;;  %v970_v39 = vpop.permute.xlu0 %969 }
 0x2a0   : > { %3316 = vmatpush3.msra.mxu1 %v892_v27  ;;  %3317 = vmatprep.mubr.msk.f32.mxu1 %vm3595_vm1, %v3594_v8 }
 0x2a1   : > { %3320 = vmatprep.subr.mxu1 %v3594_v8 }
 0x2a3   : > { %v968_v40 = vpop.permute.xlu0 %967 }
 0x372   : > { %v868_v29 = vpop.f32.mrb[4].mxu1 }
 0x373   : > { %v872_v30 = vmul.f32 0.35355338, %v868_v29  ;;  %v3314_v31 = vpop.f32.mrb[5].mxu1 }
 0x375   : > { %v879_v32 = vadd.f32 %v3794_v28, %v872_v30 }
 0x377   : > { %v880_v33 = vsel %vm797_vm2, %v879_v32, -inf }
 0x378   : > { %881 = vmax.xlane.f32.xlu1 %v880_v33 }
 0x389   : > { %1136 = vrot.lane.b32.xlu1 %v3773_v22, %s4195_s23  ;;  %s4197_s23 = smov 16  }
 0x405   : > { %v882_v34 = vpop.xlane.xlu1 %881 }
 0x406   : > { %v883_v35 = vsub.f32 %v879_v32, %v882_v34 }
 0x408   : > { %v884_v36 = vmul.f32 1.442695, %v883_v35 }
 0x409   : > { %v1137_v45 = vpop.permute.xlu1 %1136 }
 0x40a   : > { %3538 = vpow2.f32 %v884_v36 }
 0x414   : > { %v3539_v37 = vpop.eup %3538 }
 0x415   : > { %v886_v38 = vsel %vm797_vm2, %v3539_v37, 0.0 }
 0x416   : > { %887 = vadd.xlane.f32.xlu0 %v886_v38 }
 0x42c   : > { %1134 = vrot.lane.b32.xlu0 %v3773_v22, %s4199_s1  ;;  %s4216_s1 = smov 104  }
 0x430   : > { %1303 = vrot.lane.b32.xlu0 %v3773_v22, %s4193_s27  ;;  %s4214_s27 = smov 112  }
 0x434   : > { %1301 = vrot.lane.b32.xlu0 %v3773_v22, %s4194_s30  ;;  %s4198_s30 = smov 8  }
 0x4a3   : > { %v888_v41 = vpop.xlane.xlu0 %887 }
 0x4a4   : > { %3540 = vrcp.f32 %v888_v41 }
 0x4a7   : > { %v1135_v44 = vpop.permute.xlu0 %1134 }
 0x4ab   : > { %v1304_v46 = vpop.permute.xlu0 %1303 }
 0x4ae   : > { %v3541_v42 = vpop.eup %3540 }
 0x4af   : > { %v890_v43 = vmul.f32 %v3541_v42, %v3539_v37  ;;  %v1302_v47 = vpop.permute.xlu0 %1301 }
 0x4b1   : > { %3318 = vmatmul.mubr.msk.f32.vlgmr.msra.gmra.mrb[6].mxu1 %vm797_vm2, %v890_v43 }
 0x4b2   : > { %3321 = vmatpush3.xpose.msk.msra.mxu1 %vm797_vm2, %v970_v39  ;;  %3322 = vmatprep.mubr.msk.f32.mxu1 %vm3595_vm1, %v3594_v8 }
 0x4b3   : > { %3330 = vmatprep.subr.mxu1 %v3594_v8 }
 0x4b5   : > { %3323 = vmatmul.mubr.msk.f32.vlgmr.msra.gmra.mrb[8].mxu1 %vm797_vm2, %v968_v40 }
 0x4b6   : > { %3331 = vmatpush3.xpose.msk.msra.mxu1 %vm797_vm2, %v1137_v45  ;;  %3332 = vmatprep.mubr.msk.f32.mxu1 %vm3595_vm1, %v3594_v8 }
 0x4b7   : > { %3340 = vmatprep.subr.mxu1 %v3594_v8 }
 0x4b9   : > { %3333 = vmatmul.mubr.msk.f32.vlgmr.msra.gmra.mrb[10].mxu1 %vm797_vm2, %v1135_v44 }
 0x4ba   : > { %3341 = vmatpush3.xpose.msk.msra.mxu1 %vm797_vm2, %v1304_v46  ;;  %3342 = vmatprep.mubr.msk.f32.mxu1 %vm3595_vm1, %v3594_v8  ;;  %v3132_v46 = vld [vmem:[%s4169_s7] ss:$0 sm:$0xff] }
 0x4bb   : > { %3350 = vmatprep.subr.bf16.mxu1 %v3594_v8 }
 0x4bd   : > { %3343 = vmatmul.mubr.msk.f32.vlgmr.msra.gmra.mrb[12].mxu1 %vm797_vm2, %v1302_v47 }
 0x4be   : > { %3354 = vmatprep.mubr.msk.bf16.mxu1 %vm3595_vm1, %v3594_v8 }
 0x584   : > { %v3825_v48 = vpop.f32.mrb[6].mxu1 }
 0x585   : > { %v3319_v49 = vpop.f32.mrb[7].mxu1 }
 0x588   : > { %v1041_v50 = vpop.f32.mrb[8].mxu1 }
 0x589   : > { %v1045_v51 = vmul.f32 0.35355338, %v1041_v50  ;;  %v3324_v52 = vpop.f32.mrb[9].mxu1 }
 0x58b   : > { %v1046_v53 = vadd.f32 %v3794_v28, %v1045_v51 }
 0x58c   : > { %v1208_v54 = vpop.f32.mrb[10].mxu1 }
 0x58d   : > { %v1212_v55 = vmul.f32 0.35355338, %v1208_v54  ;;  %v3334_v56 = vpop.f32.mrb[11].mxu1  ;;  %v1047_v57 = vsel %vm797_vm2, %v1046_v53, -inf }
 0x58e   : > { %1048 = vmax.xlane.f32.xlu0 %v1047_v57 }
 0x58f   : > { %v1213_v58 = vadd.f32 %v3794_v28, %v1212_v55 }
 0x590   : > { %v1375_v59 = vpop.f32.mrb[12].mxu1 }
 0x591   : > { %v1379_v60 = vmul.f32 0.35355338, %v1375_v59  ;;  %v3344_v61 = vpop.f32.mrb[13].mxu1  ;;  %v1214_v62 = vsel %vm797_vm2, %v1213_v58, -inf  ;;  %v3510_v59 = vld [vmem:[%s4172_s10] sm:$0xff]  }
 0x592   : > { %1215 = vmax.xlane.f32.xlu1 %v1214_v62 }
 0x593   : > { %v1380_v63 = vadd.f32 %v3794_v28, %v1379_v60  ;;  %v3511_v60 = vld [vmem:[%s4172_s10 + $0x8] sm:$0xff]  }
 0x595   : > { %v1381_v0 = vsel %vm797_vm2, %v1380_v63, -inf }
 0x596   : > { %1382 = vmax.xlane.f32.xlu0 %v1381_v0  ;;  %v3136_v0 = vld [vmem:[%s4170_s8] ss:$0 sm:$0xff] }
 0x5a3   : > { %1225 = vrot.lane.b32.xlu1 %v3773_v22, %s4191_s4  ;;  %s4213_s4 = sld [smem:[#allocation8_spill]] }
 0x5a9   : > { %v3508_v31 = vld [vmem:[%s4213_s4] sm:$0xff]   ;;  %v3509_v32 = vld [vmem:[%s4213_s4 + $0x8] sm:$0xff]  }
 0x5aa   : > { %3351 = vmatpush3.bf16.msra.mxu1 %v3508_v31 }
 0x5ab   : > { %3352 = vmatprep.subr.bf16.mxu1 %v3594_v8 }
 0x5ae   : > { %3353 = vmatpush3.bf16.msra.mxu1 %v3509_v32 }
 0x5af   : > { %3358 = vmatprep.subr.bf16.mxu1 %v3594_v8 }
 0x61b   : > { %v1049_v1 = vpop.xlane.xlu0 %1048 }
 0x61c   : > { %v1050_v2 = vsub.f32 %v1046_v53, %v1049_v1 }
 0x61e   : > { %v1051_v3 = vmul.f32 1.442695, %v1050_v2  ;;  %v3137_v2 = vld [vmem:[%s4171_s9] ss:$0 sm:$0xff] }
 0x61f   : > { %v1216_v4 = vpop.xlane.xlu1 %1215 }
 0x620   : > { %3542 = vpow2.f32 %v1051_v3  ;;  %v1217_v5 = vsub.f32 %v1213_v58, %v1216_v4 }
 0x622   : > { %v1218_v6 = vmul.f32 1.442695, %v1217_v5 }
 0x623   : > { %v1383_v7 = vpop.xlane.xlu0 %1382  ;;  %v1226_v19 = vpop.permute.xlu1 %1225 }
 0x624   : > { %3544 = vpow2.f32 %v1218_v6  ;;  %v1384_v9 = vsub.f32 %v1380_v63, %v1383_v7  ;;  %v3512_v6 = vld [vmem:[%s4174_s12] sm:$0xff]   ;;  %v3513_v7 = vld [vmem:[%s4174_s12 + $0x8] sm:$0xff]  }
 0x626   : > { %v1385_v10 = vmul.f32 1.442695, %v1384_v9  ;;  %v3514_v9 = vld [vmem:[%s4174_s12 + $0x10] sm:$0xff]  }
 0x628   : > { %3546 = vpow2.f32 %v1385_v10  ;;  %v3515_v10 = vld [vmem:[%s4174_s12 + $0x18] sm:$0xff]  }
 0x62a   : > { %v3543_v11 = vpop.eup %3542 }
 0x62b   : > { %v1053_v12 = vsel %vm797_vm2, %v3543_v11, 0.0 }
 0x62c   : > { %1054 = vadd.xlane.f32.xlu0 %v1053_v12 }
 0x62e   : > { %v3545_v13 = vpop.eup %3544 }
 0x62f   : > { %v1220_v14 = vsel %vm797_vm2, %v3545_v13, 0.0 }
 0x630   : > { %1221 = vadd.xlane.f32.xlu0 %v1220_v14 }
 0x632   : > { %v3547_v15 = vpop.eup %3546 }
 0x633   : > { %v1387_v16 = vsel %vm797_vm2, %v3547_v15, 0.0 }
 0x634   : > { %1388 = vadd.xlane.f32.xlu1 %v1387_v16 }
 0x645   : > { %1392 = vrot.lane.b32.xlu1 %v3773_v22, %s4190_s0  ;;  %s4221_s0 = smov 56  }
 0x646   : > { %1058 = vrot.lane.b32.xlu0 %v3773_v22, %s4189_s29  ;;  %s4196_s29 = smov 24  }
 0x6b9   : > { %v1055_v17 = vpop.xlane.xlu0 %1054 }
 0x6ba   : > { %3548 = vrcp.f32 %v1055_v17 }
 0x6bd   : > { %v1222_v20 = vpop.xlane.xlu0 %1221 }
 0x6be   : > { %3550 = vrcp.f32 %v1222_v20 }
 0x6c1   : > { %v1389_v21 = vpop.xlane.xlu1 %1388  ;;  %v1059_v23 = vpop.permute.xlu0 %1058 }
 0x6c2   : > { %3552 = vrcp.f32 %v1389_v21  ;;  %3326 = vmatpush3.msra.mxu0 %v1059_v23 }
 0x6c3   : > { %3335 = vmatprep.subr.mxu0 %v3594_v8 }
 0x6c4   : > { %v3549_v24 = vpop.eup %3548 }
 0x6c5   : > { %v1057_v25 = vmul.f32 %v3549_v24, %v3543_v11  ;;  %v1393_v27 = vpop.permute.xlu1 %1392  ;;  %v3138_v11 = vld [vmem:[%s4173_s11] ss:$0 sm:$0xff] }
 0x6c7   : > { %3328 = vmatmul.mubr.msk.f32.vlgmr.msra.gmra.mrb[0].mxu0 %vm797_vm2, %v1057_v25  ;;  %v3142_v25 = vld [vmem:[%s4175_s13] ss:$0 sm:$0xff] }
 0x6c8   : > { %v3551_v26 = vpop.eup %3550  ;;  %3336 = vmatpush3.msra.mxu0 %v1226_v19  ;;  %3337 = vmatprep.mubr.msk.f32.mxu0 %vm3595_vm1, %v3594_v8 }
 0x6c9   : > { %v1224_v22 = vmul.f32 %v3551_v26, %v3545_v13  ;;  %3345 = vmatprep.subr.mxu0 %v3594_v8 }
 0x6cb   : > { %3338 = vmatmul.mubr.msk.f32.vlgmr.msra.gmra.mrb[2].mxu0 %vm797_vm2, %v1224_v22 }
 0x6cc   : > { %v3553_v29 = vpop.eup %3552  ;;  %3346 = vmatpush3.msra.mxu0 %v1393_v27  ;;  %3347 = vmatprep.mubr.msk.f32.mxu0 %vm3595_vm1, %v3594_v8 }
 0x6cd   : > { %v1391_v30 = vmul.f32 %v3553_v29, %v3547_v15  ;;  %3386 = vmatprep.subr.mxu0 %v3594_v8 }
 0x6cf   : > { %3348 = vmatmul.mubr.msk.f32.vlgmr.msra.gmra.mrb[4].mxu0 %vm797_vm2, %v1391_v30 }
 0x6d0   : > { %3388 = vmatprep.mubr.msk.f32.mxu0 %vm3595_vm1, %v3594_v8 }
 0x79a   : > { %v1130_v33 = vpop.f32.mrb[0].mxu0 }
 0x79b   : > { %1469 = vrot.lane.b32.xlu1 %v1130_v33, %s4198_s30  ;;  %v3329_v34 = vpop.f32.mrb[1].mxu0  ;;  %s4217_s30 = smov 72  }
 0x79e   : > { %v1297_v35 = vpop.f32.mrb[2].mxu0 }
 0x79f   : > { %1473 = vrot.lane.b32.xlu0 %v1297_v35, %s4197_s23  ;;  %v3339_v36 = vpop.f32.mrb[3].mxu0  ;;  %s4215_s23 = smov 80  }
 0x7a2   : > { %v1464_v37 = vpop.f32.mrb[4].mxu0 }
 0x7a3   : > { %1477 = vrot.lane.b32.xlu1 %v1464_v37, %s4196_s29  ;;  %v3349_v38 = vpop.f32.mrb[5].mxu0  ;;  %s4225_s29 = sshll.u32 %s4227_s28, 3 }
 0x7a4   : > { %v3516_v38 = vld [vmem:[%s4208_s24 + $0x10] sm:$0xff]  }
 0x80d   : > { %v1470_v39 = vpop.permute.xlu1 %1469 }
 0x80e   : > { %v1480_v41 = vsel %vm797_vm2, %v3825_v48, %v1470_v39  ;;  %v3517_v39 = vld [vmem:[%s4208_s24 + $0x18] sm:$0xff]  }
 0x811   : > { %v1474_v40 = vpop.permute.xlu0 %1473 }
 0x812   : > { %v1482_v42 = vsel %vm1481_vm3, %v1480_v41, %v1474_v40 }
 0x815   : > { %v1478_v43 = vpop.permute.xlu1 %1477 }
 0x816   : > { %v1484_v44 = vsel %vm1483_vm4, %v1482_v42, %v1478_v43 }
 0x817   : > { %v1490_v45 = vpack.c.bf16 %v1484_v44, %v1484_v44  ;;  %v3148_v44 = vld [vmem:[%s4176_s14] ss:$0 sm:$0xff] }
 0x819   : > { %3355 = vmatmul.mubr.msk.bf16.vlgmr.msra.gmra.mrb[16].mxu1 %vm697_vm0, %v1490_v45 }
 0x81a   : > { %3362 = vmatprep.mubr.msk.bf16.mxu1 %vm3595_vm1, %v3594_v8  ;;  %3359 = vmatpush3.bf16.msra.mxu1 %v3510_v59 }
 0x81b   : > { %3360 = vmatprep.subr.bf16.mxu1 %v3594_v8 }
 0x81e   : > { %3361 = vmatpush3.bf16.msra.mxu1 %v3511_v60 }
 0x81f   : > { %3366 = vmatprep.subr.bf16.mxu1 %v3594_v8 }
 0x8ec   : > { %v1546_v47 = vpop.f32.mrb[16].mxu1 }
 0x8ed   : > { %v1547_v49 = vadd.f32 %v3132_v46, %v1546_v47  ;;  %v3356_v50 = vpop.f32.mrb[17].mxu1  ;;  %v3149_v46 = vld [vmem:[%s4177_s15] ss:$0 sm:$0xff] }
 0x8ee   : > { %v1549_v51 = vpop.f32.mrb[18].mxu1 }
 0x8ef   : > { %v3357_v48 = vpop.f32.mrb[19].mxu1  ;;  %v1552_v52 = vadd.f32 %v1547_v49, %v3763_v18  ;;  %v3155_v51 = vld [vmem:[%s4211_s5 + $0x1] ss:$0 sm:$0xff] }
 0x8f1   : > { %v1555_v53 = vsel %vm697_vm0, %v1552_v52, 0.0 }
 0x8f2   : > { %1556 = vadd.xlane.f32.xlu0 %v1555_v53 }
 0x97f   : > { %v1557_v54 = vpop.xlane.xlu0 %1556 }
 0x980   : > { %v1558_v55 = vmul.f32 0.03125, %v1557_v54 }
 0x982   : > { %v1559_v56 = vsub.f32 %v1552_v52, %v1558_v55 }
 0x984   : > { %v1560_v57 = vmul.f32 %v1559_v56, %v1559_v56 }
 0x986   : > { %v1561_v58 = vsel %vm697_vm0, %v1560_v57, 0.0 }
 0x987   : > { %1562 = vadd.xlane.f32.xlu1 %v1561_v58 }
 0xa14   : > { %v1563_v18 = vpop.xlane.xlu1 %1562 }
 0xa15   : > { %v1564_v61 = vmul.f32 0.03125, %v1563_v18 }
 0xa17   : > { %v1565_v62 = vadd.f32 1e-12, %v1564_v61 }
 0xa19   : > { %3554 = vrsqrt.f32 %v1565_v62 }
 0xa23   : > { %v3555_v63 = vpop.eup %3554 }
 0xa24   : > { %v1567_v1 = vmul.f32 %v3555_v63, %v1559_v56 }
 0xa26   : > { %v1574_v3 = vmul.f32 %v3136_v0, %v1567_v1 }
 0xa28   : > { %v1581_v4 = vadd.f32 %v3137_v2, %v1574_v3 }
 0xa2a   : > { %v1587_v5 = vpack.c.bf16 %v1581_v4, %v1581_v4 }
 0xa2c   : > { %3363 = vmatmul.mubr.msk.bf16.vlgmr.msra.gmra.mrb[20].mxu1 %vm697_vm0, %v1587_v5 }
 0xa2d   : > { %3374 = vmatprep.mubr.msk.bf16.mxu1 %vm3595_vm1, %v3594_v8  ;;  %3367 = vmatpush3.bf16.msra.mxu1 %v3512_v6 }
 0xa2e   : > { %3368 = vmatprep.subr.bf16.mxu1 %v3594_v8 }
 0xa31   : > { %3369 = vmatpush3.bf16.msra.mxu1 %v3513_v7 }
 0xa32   : > { %3370 = vmatprep.subr.bf16.mxu1 %v3594_v8 }
 0xa35   : > { %3371 = vmatpush3.bf16.msra.mxu1 %v3514_v9 }
 0xa36   : > { %3372 = vmatprep.subr.bf16.mxu1 %v3594_v8 }
 0xa39   : > { %3373 = vmatpush3.bf16.msra.mxu1 %v3515_v10 }
 0xa3a   : > { %3378 = vmatprep.subr.bf16.mxu1 %v3594_v8 }
 0xaff   : > { %v1643_v12 = vpop.f32.mrb[20].mxu1 }
 0xb00   : > { %v1644_v13 = vadd.f32 %v3138_v11, %v1643_v12  ;;  %v3364_v14 = vpop.f32.mrb[21].mxu1 }
 0xb01   : > { %v1646_v15 = vpop.f32.mrb[22].mxu1 }
 0xb02   : > { %v1650_v16 = vmul.f32 0.70710677, %v1644_v13  ;;  %v3365_v17 = vpop.f32.mrb[23].mxu1  ;;  %v1649_v20 = vmul.f32 0.5, %v1644_v13 }
 0xb04   : > { %3556 = verf.f32 %v1650_v16 }
 0xb0e   : > { %v3557_v19 = vpop.eup %3556 }
 0xb0f   : > { %v1652_v21 = vadd.f32 1.0, %v3557_v19 }
 0xb11   : > { %v1653_v23 = vmul.f32 %v1652_v21, %v1649_v20 }
 0xb13   : > { %v1663_v24 = vpack.c.bf16 %v1653_v23, %v1653_v23 }
 0xb15   : > { %3375 = vmatmul.mubr.msk.bf16.vlgmr.msra.gmra.mrb[24].mxu1 %vm1694_vm5, %v1663_v24 }
 0xb16   : > { %3382 = vmatprep.mubr.msk.bf16.mxu1 %vm3595_vm1, %v3594_v8  ;;  %3379 = vmatpush3.bf16.msra.mxu1 %v3516_v38 }
 0xb17   : > { %3380 = vmatprep.subr.bf16.mxu1 %v3594_v8 }
 0xb1a   : > { %3381 = vmatpush3.bf16.msra.mxu1 %v3517_v39 }
 0xb1b   : > { %3396 = vmatprep.subr.mxu1 %v3594_v8 }
 0xbe8   : > { %v1732_v26 = vpop.f32.mrb[24].mxu1 }
 0xbe9   : > { %v1733_v22 = vadd.f32 %v3142_v25, %v1732_v26  ;;  %v3376_v27 = vpop.f32.mrb[25].mxu1 }
 0xbea   : > { %v1735_v29 = vpop.f32.mrb[26].mxu1 }
 0xbeb   : > { %v3377_v30 = vpop.f32.mrb[27].mxu1  ;;  %v1738_v31 = vadd.f32 %v1733_v22, %v1581_v4 }
 0xbed   : > { %v1741_v32 = vsel %vm697_vm0, %v1738_v31, 0.0 }
 0xbee   : > { %1742 = vadd.xlane.f32.xlu0 %v1741_v32 }
 0xc7b   : > { %v1743_v33 = vpop.xlane.xlu0 %1742 }
 0xc7c   : > { %v1744_v34 = vmul.f32 0.03125, %v1743_v33 }
 0xc7e   : > { %v1745_v35 = vsub.f32 %v1738_v31, %v1744_v34 }
 0xc80   : > { %v1746_v36 = vmul.f32 %v1745_v35, %v1745_v35 }
 0xc82   : > { %v1747_v37 = vsel %vm697_vm0, %v1746_v36, 0.0 }
 0xc83   : > { %1748 = vadd.xlane.f32.xlu0 %v1747_v37 }
 0xd10   : > { %v1749_v40 = vpop.xlane.xlu0 %1748 }
 0xd11   : > { %v1750_v41 = vmul.f32 0.03125, %v1749_v40 }
 0xd13   : > { %v1751_v42 = vadd.f32 1e-12, %v1750_v41 }
 0xd15   : > { %3558 = vrsqrt.f32 %v1751_v42 }
 0xd1f   : > { %v3559_v43 = vpop.eup %3558 }
 0xd20   : > { %v1753_v45 = vmul.f32 %v3559_v43, %v1745_v35 }
 0xd22   : > { %v1760_v47 = vmul.f32 %v3148_v44, %v1753_v45 }
 0xd24   : > { %v3936_v49 = vadd.f32 %v3149_v46, %v1760_v47 }
 0xd26   : > { %v1775_v50 = vpack.c.bf16 %v3936_v49, %v3936_v49 }
 0xd28   : > { %3383 = vmatmul.mubr.msk.bf16.vlgmr.msra.gmra.mrb[28].mxu1 %vm697_vm0, %v1775_v50 }
 0xd29   : > { %3398 = vmatprep.mubr.msk.f32.mxu1 %vm3595_vm1, %v3594_v8 }
 0xdfb   : > { %v1831_v48 = vpop.f32.mrb[28].mxu1 }
 0xdfc   : > { %v3946_v52 = vadd.f32 %v3155_v51, %v1831_v48  ;;  %v3384_v53 = vpop.f32.mrb[29].mxu1 }
 0xdfd   : > { %v1834_v54 = vpop.f32.mrb[30].mxu1 }
 0xdfe   : > { %2005 = vrot.lane.b32.xlu1 %v3946_v52, %s3598_s26  ;;  %1838 = vrot.lane.b32.xlu0 %v3946_v52, %s3597_s25  ;;  %v3385_v55 = vpop.f32.mrb[31].mxu1  ;;  %s4218_s25 = smov 64   ;;  %s4219_s26 = smov 48  }
 0xe02   : > { %2003 = vrot.lane.b32.xlu1 %v3946_v52, %s3599_s2  ;;  %2170 = vrot.lane.b32.xlu0 %v3946_v52, %s4214_s27  ;;  %s4220_s2 = smov 40  }
 0xe06   : > { %2172 = vrot.lane.b32.xlu1 %v3946_v52, %s4215_s23  ;;  %2337 = vrot.lane.b32.xlu0 %v3946_v52, %s4216_s1  ;;  %s4222_s1 = smov 8  }
 0xe0a   : > { %2339 = vrot.lane.b32.xlu1 %v3946_v52, %s4217_s30  ;;  %s4223_s30 = smov 16  }
 0xe70   : > { %v2006_v56 = vpop.permute.xlu1 %2005  ;;  %v1839_v57 = vpop.permute.xlu0 %1838 }
 0xe71   : > { %3387 = vmatpush3.xpose.msk.msra.mxu0 %vm797_vm2, %v1839_v57  ;;  %3397 = vmatpush3.xpose.msk.msra.mxu1 %vm797_vm2, %v2006_v56  ;;  %v3518_v57 = vld [vmem:[%s4213_s4 + $0x10] sm:$0xff]  }
 0xe72   : > { %3406 = vmatprep.subr.mxu1 %v3594_v8  ;;  %3391 = vmatprep.subr.mxu0 %v3594_v8 }
 0xe74   : > { %v2004_v58 = vpop.permute.xlu1 %2003  ;;  %3389 = vmatmul.mubr.msk.f32.vlgmr.msra.gmra.mrb[6].mxu0 %vm797_vm2, %v3946_v52  ;;  %v2171_v60 = vpop.permute.xlu0 %2170 }
 0xe75   : > { %3399 = vmatmul.mubr.msk.f32.vlgmr.msra.gmra.mrb[14].mxu1 %vm797_vm2, %v2004_v58  ;;  %3393 = vmatprep.mubr.msk.f32.mxu0 %vm3595_vm1, %v3594_v8  ;;  %v3519_v58 = vld [vmem:[%s4213_s4 + $0x18] sm:$0xff]  }
 0xe76   : > { %3408 = vmatprep.mubr.msk.f32.mxu1 %vm3595_vm1, %v3594_v8 }
 0xe78   : > { %v2173_v59 = vpop.permute.xlu1 %2172  ;;  %v2338_v61 = vpop.permute.xlu0 %2337 }
 0xe79   : > { %3407 = vmatpush3.xpose.msk.msra.mxu1 %vm797_vm2, %v2173_v59 }
 0xe7a   : > { %3416 = vmatprep.subr.mxu1 %v3594_v8 }
 0xe7c   : > { %v2340_v18 = vpop.permute.xlu1 %2339  ;;  %3409 = vmatmul.mubr.msk.f32.vlgmr.msra.gmra.mrb[32].mxu1 %vm797_vm2, %v2171_v60 }
 0xe7d   : > { %3417 = vmatpush3.xpose.msk.msra.mxu1 %vm797_vm2, %v2340_v18  ;;  %3418 = vmatprep.mubr.msk.f32.mxu1 %vm3595_vm1, %v3594_v8 }
 0xe7e   : > { %3426 = vmatprep.subr.bf16.mxu1 %v3594_v8 }
 0xe80   : > { %3419 = vmatmul.mubr.msk.f32.vlgmr.msra.gmra.mrb[34].mxu1 %vm797_vm2, %v2338_v61 }
 0xe81   : > { %3430 = vmatprep.mubr.msk.bf16.mxu1 %vm3595_vm1, %v3594_v8  ;;  %3427 = vmatpush3.bf16.msra.mxu1 %v3518_v57 }
 0xe82   : > { %3428 = vmatprep.subr.bf16.mxu1 %v3594_v8 }
 0xe85   : > { %3429 = vmatpush3.bf16.msra.mxu1 %v3519_v58 }
 0xe86   : > { %3442 = vmatprep.subr.bf16.mxu1 %v3594_v8 }
 0xf47   : > { %v1910_v62 = vpop.f32.mrb[6].mxu0 }
 0xf48   : > { %v1914_v63 = vmul.f32 0.35355338, %v1910_v62  ;;  %v3390_v0 = vpop.f32.mrb[7].mxu0  ;;  %v2077_v1 = vpop.f32.mrb[14].mxu1 }
 0xf49   : > { %v2081_v2 = vmul.f32 0.35355338, %v2077_v1  ;;  %v3400_v3 = vpop.f32.mrb[15].mxu1 }
 0xf4a   : > { %v1915_v4 = vadd.f32 %v3794_v28, %v1914_v63 }
 0xf4b   : > { %v2082_v5 = vadd.f32 %v3794_v28, %v2081_v2 }
 0xf4c   : > { %v1916_v6 = vsel %vm797_vm2, %v1915_v4, -inf }
 0xf4d   : > { %1917 = vmax.xlane.f32.xlu1 %v1916_v6  ;;  %v2083_v7 = vsel %vm797_vm2, %v2082_v5, -inf }
 0xf4e   : > { %2084 = vmax.xlane.f32.xlu0 %v2083_v7 }
 0xf4f   : > { %v2244_v9 = vpop.f32.mrb[32].mxu1 }
 0xf50   : > { %v2248_v10 = vmul.f32 0.35355338, %v2244_v9  ;;  %v3410_v11 = vpop.f32.mrb[33].mxu1 }
 0xf52   : > { %v2249_v12 = vadd.f32 %v3794_v28, %v2248_v10  ;;  %v3176_v10 = vld [vmem:[%s4169_s7 + $0x1] ss:$0 sm:$0xff] }
 0xf53   : > { %v2411_v13 = vpop.f32.mrb[34].mxu1 }
 0xf54   : > { %v2415_v14 = vmul.f32 0.35355338, %v2411_v13  ;;  %v3420_v15 = vpop.f32.mrb[35].mxu1  ;;  %v2250_v16 = vsel %vm797_vm2, %v2249_v12, -inf }
 0xf55   : > { %2251 = vmax.xlane.f32.xlu0 %v2250_v16 }
 0xf56   : > { %v2416_v17 = vadd.f32 %v3794_v28, %v2415_v14 }
 0xf58   : > { %v2417_v19 = vsel %vm797_vm2, %v2416_v17, -inf }
 0xf59   : > { %2418 = vmax.xlane.f32.xlu0 %v2417_v19 }
 0xf5e   : > { %1927 = vrot.lane.b32.xlu1 %v3946_v52, %s4218_s25  ;;  %s4224_s25 = smov 24  }
 0xfda   : > { %v1918_v20 = vpop.xlane.xlu1 %1917 }
 0xfdb   : > { %v1919_v21 = vsub.f32 %v1915_v4, %v1918_v20  ;;  %v2085_v23 = vpop.xlane.xlu0 %2084 }
 0xfdc   : > { %v2086_v24 = vsub.f32 %v2082_v5, %v2085_v23 }
 0xfdd   : > { %v1920_v25 = vmul.f32 1.442695, %v1919_v21 }
 0xfde   : > { %v2087_v26 = vmul.f32 1.442695, %v2086_v24  ;;  %v1928_v22 = vpop.permute.xlu1 %1927 }
 0xfdf   : > { %3560 = vpow2.f32 %v1920_v25  ;;  %3392 = vmatpush3.msra.mxu0 %v1928_v22  ;;  %v3520_v25 = vld [vmem:[%s4172_s10 + $0x10] sm:$0xff]  }
 0xfe0   : > { %3562 = vpow2.f32 %v2087_v26  ;;  %3401 = vmatprep.subr.mxu0 %v3594_v8  ;;  %v3521_v26 = vld [vmem:[%s4172_s10 + $0x18] sm:$0xff]  }
 0xfe2   : > { %v2252_v27 = vpop.xlane.xlu0 %2251 }
 0xfe3   : > { %v2253_v28 = vsub.f32 %v2249_v12, %v2252_v27 }
 0xfe5   : > { %v2254_v29 = vmul.f32 1.442695, %v2253_v28 }
 0xfe6   : > { %v2419_v30 = vpop.xlane.xlu0 %2418 }
 0xfe7   : > { %3564 = vpow2.f32 %v2254_v29  ;;  %v2420_v31 = vsub.f32 %v2416_v17, %v2419_v30  ;;  %v3182_v29 = vld [vmem:[%s4170_s8 + $0x1] ss:$0 sm:$0xff] }
 0xfe9   : > { %v3561_v32 = vpop.eup %3560  ;;  %v2421_v33 = vmul.f32 1.442695, %v2420_v31  ;;  %v3183_v31 = vld [vmem:[%s4171_s9 + $0x1] ss:$0 sm:$0xff] }
 0xfea   : > { %v3563_v34 = vpop.eup %3562  ;;  %v1922_v35 = vsel %vm797_vm2, %v3561_v32, 0.0 }
 0xfeb   : > { %3566 = vpow2.f32 %v2421_v33  ;;  %1923 = vadd.xlane.f32.xlu1 %v1922_v35  ;;  %v2089_v36 = vsel %vm797_vm2, %v3563_v34, 0.0  ;;  %v3522_v35 = vld [vmem:[%s4174_s12 + $0x20] sm:$0xff]  }
 0xfec   : > { %2090 = vadd.xlane.f32.xlu0 %v2089_v36  ;;  %v3523_v36 = vld [vmem:[%s4174_s12 + $0x28] sm:$0xff]  }
 0xff1   : > { %v3565_v37 = vpop.eup %3564 }
 0xff2   : > { %v2256_v38 = vsel %vm797_vm2, %v3565_v37, 0.0 }
 0xff3   : > { %2257 = vadd.xlane.f32.xlu1 %v2256_v38  ;;  %v3525_v38 = vld [vmem:[%s4174_s12 + $0x38] sm:$0xff]  }
 0xff5   : > { %v3567_v39 = vpop.eup %3566 }
 0xff6   : > { %v2423_v40 = vsel %vm797_vm2, %v3567_v39, 0.0 }
 0xff7   : > { %2424 = vadd.xlane.f32.xlu0 %v2423_v40 }
0x1004   : > { %2261 = vrot.lane.b32.xlu1 %v3946_v52, %s4219_s26 }
0x1008   : > { %2428 = vrot.lane.b32.xlu1 %v3946_v52, %s4220_s2 }
0x100d   : > { %2094 = vrot.lane.b32.xlu0 %v3946_v52, %s4221_s0 }
0x1078   : > { %v1924_v41 = vpop.xlane.xlu1 %1923 }
0x1079   : > { %3568 = vrcp.f32 %v1924_v41  ;;  %v2091_v42 = vpop.xlane.xlu0 %2090 }
0x107a   : > { %3570 = vrcp.f32 %v2091_v42 }
0x1080   : > { %v2258_v43 = vpop.xlane.xlu1 %2257 }
0x1081   : > { %3572 = vrcp.f32 %v2258_v43 }
0x1083   : > { %v3569_v44 = vpop.eup %3568 }
0x1084   : > { %v1926_v45 = vmul.f32 %v3569_v44, %v3561_v32  ;;  %v2425_v46 = vpop.xlane.xlu0 %2424  ;;  %v3571_v47 = vpop.eup %3570 }
0x1085   : > { %3574 = vrcp.f32 %v2425_v46  ;;  %v2093_v50 = vmul.f32 %v3571_v47, %v3563_v34  ;;  %v2262_v51 = vpop.permute.xlu1 %2261 }
0x1086   : > { %3394 = vmatmul.mubr.msk.f32.vlgmr.msra.gmra.mrb[8].mxu0 %vm797_vm2, %v1926_v45 }
0x1087   : > { %3403 = vmatprep.mubr.msk.f32.mxu0 %vm3595_vm1, %v3594_v8 }
0x1088   : > { %v2095_v48 = vpop.permute.xlu0 %2094 }
0x1089   : > { %3402 = vmatpush3.msra.mxu0 %v2095_v48  ;;  %v2429_v54 = vpop.permute.xlu1 %2428 }
0x108a   : > { %3404 = vmatmul.mubr.msk.f32.vlgmr.msra.gmra.mrb[10].mxu0 %vm797_vm2, %v2093_v50  ;;  %3411 = vmatprep.subr.mxu0 %v3594_v8 }
0x108b   : > { %v3573_v52 = vpop.eup %3572  ;;  %3412 = vmatpush3.msra.mxu0 %v2262_v51  ;;  %3413 = vmatprep.mubr.msk.f32.mxu0 %vm3595_vm1, %v3594_v8 }
0x108c   : > { %v2260_v53 = vmul.f32 %v3573_v52, %v3565_v37  ;;  %3421 = vmatprep.subr.mxu0 %v3594_v8  ;;  %v3524_v37 = vld [vmem:[%s4174_s12 + $0x30] sm:$0xff]   ;;  %v3202_v52 = vld [vmem:[%s4175_s13 + $0x1] ss:$0 sm:$0xff] }
0x108e   : > { %3414 = vmatmul.mubr.msk.f32.vlgmr.msra.gmra.mrb[12].mxu0 %vm797_vm2, %v2260_v53 }
0x108f   : > { %v3575_v55 = vpop.eup %3574  ;;  %3422 = vmatpush3.msra.mxu0 %v2429_v54  ;;  %3423 = vmatprep.mubr.msk.f32.mxu0 %vm3595_vm1, %v3594_v8 }
0x1090   : > { %v2427_v56 = vmul.f32 %v3575_v55, %v3567_v39  ;;  %3434 = vmatprep.subr.bf16.mxu0 %v3594_v8  ;;  %v3189_v39 = vld [vmem:[%s4173_s11 + $0x1] ss:$0 sm:$0xff] }
0x1092   : > { %3424 = vmatmul.mubr.msk.f32.vlgmr.msra.gmra.mrb[14].mxu0 %vm797_vm2, %v2427_v56 }
0x1093   : > { %3438 = vmatprep.mubr.msk.bf16.mxu0 %vm3595_vm1, %v3594_v8  ;;  %3435 = vmatpush3.bf16.msra.mxu0 %v3520_v25 }
0x1094   : > { %3436 = vmatprep.subr.bf16.mxu0 %v3594_v8 }
0x1097   : > { %3437 = vmatpush3.bf16.msra.mxu0 %v3521_v26 }
0x1098   : > { %3454 = vmatprep.subr.bf16.mxu0 %v3594_v8 }
0x1159   : > { %v1999_v59 = vpop.f32.mrb[8].mxu0 }
0x115a   : > { %v3395_v60 = vpop.f32.mrb[9].mxu0 }
0x115d   : > { %v2166_v18 = vpop.f32.mrb[10].mxu0 }
0x115e   : > { %2505 = vrot.lane.b32.xlu1 %v2166_v18, %s4222_s1  ;;  %v3405_v61 = vpop.f32.mrb[11].mxu0  ;;  %s692_s1 = scalar_lea.vmem %s4184_s22, %s4225_s29 }
0x1161   : > { %v2333_v62 = vpop.f32.mrb[12].mxu0 }
0x1162   : > { %2509 = vrot.lane.b32.xlu0 %v2333_v62, %s4223_s30  ;;  %v3415_v63 = vpop.f32.mrb[13].mxu0 }
0x1165   : > { %v2500_v0 = vpop.f32.mrb[14].mxu0 }
0x1166   : > { %2513 = vrot.lane.b32.xlu1 %v2500_v0, %s4224_s25  ;;  %v3425_v1 = vpop.f32.mrb[15].mxu0  ;;  %v3526_v0 = vld [vmem:[%s4178_s16] sm:$0xff]  }
0x1167   : > { %v3527_v1 = vld [vmem:[%s4178_s16 + $0x8] sm:$0xff]  }
0x11d0   : > { %v2506_v2 = vpop.permute.xlu1 %2505 }
0x11d1   : > { %v2516_v4 = vsel %vm797_vm2, %v1999_v59, %v2506_v2 }
0x11d4   : > { %v2510_v3 = vpop.permute.xlu0 %2509 }
0x11d5   : > { %v2517_v5 = vsel %vm1481_vm3, %v2516_v4, %v2510_v3 }
0x11d8   : > { %v2514_v6 = vpop.permute.xlu1 %2513 }
0x11d9   : > { %v2518_v7 = vsel %vm1483_vm4, %v2517_v5, %v2514_v6  ;;  %v3210_v6 = vld [vmem:[%s4176_s14 + $0x1] ss:$0 sm:$0xff] }
0x11da   : > { %v2526_v9 = vpack.c.bf16 %v2518_v7, %v2518_v7 }
0x11dc   : > { %3431 = vmatmul.mubr.msk.bf16.vlgmr.msra.gmra.mrb[36].mxu1 %vm697_vm0, %v2526_v9  ;;  %v3211_v9 = vld [vmem:[%s4177_s15 + $0x1] ss:$0 sm:$0xff] }
0x11dd   : > { %3450 = vmatprep.mubr.msk.bf16.mxu1 %vm3595_vm1, %v3594_v8  ;;  %3443 = vmatpush3.bf16.msra.mxu1 %v3522_v35 }
0x11de   : > { %3444 = vmatprep.subr.bf16.mxu1 %v3594_v8 }
0x11e1   : > { %3445 = vmatpush3.bf16.msra.mxu1 %v3523_v36 }
0x11e2   : > { %3446 = vmatprep.subr.bf16.mxu1 %v3594_v8 }
0x11e5   : > { %3447 = vmatpush3.bf16.msra.mxu1 %v3524_v37 }
0x11e6   : > { %3448 = vmatprep.subr.bf16.mxu1 %v3594_v8 }
0x11e9   : > { %3449 = vmatpush3.bf16.msra.mxu1 %v3525_v38 }
0x12af   : > { %v2582_v11 = vpop.f32.mrb[36].mxu1 }
0x12b0   : > { %v2583_v12 = vadd.f32 %v3176_v10, %v2582_v11  ;;  %v3432_v13 = vpop.f32.mrb[37].mxu1 }
0x12b1   : > { %v2585_v14 = vpop.f32.mrb[38].mxu1  ;;  %v3212_v13 = vld [vmem:[%s4179_s17] ss:$0 sm:$0xff] }
0x12b2   : > { %v3433_v15 = vpop.f32.mrb[39].mxu1  ;;  %v2588_v16 = vadd.f32 %v2583_v12, %v3936_v49 }
0x12b4   : > { %v2593_v17 = vsel %vm697_vm0, %v2588_v16, 0.0 }
0x12b5   : > { %2594 = vadd.xlane.f32.xlu0 %v2593_v17 }
0x1342   : > { %v2595_v19 = vpop.xlane.xlu0 %2594 }
0x1343   : > { %v2596_v20 = vmul.f32 0.03125, %v2595_v19 }
0x1345   : > { %v2597_v21 = vsub.f32 %v2588_v16, %v2596_v20 }
0x1347   : > { %v2598_v23 = vmul.f32 %v2597_v21, %v2597_v21 }
0x1349   : > { %v2599_v24 = vsel %vm697_vm0, %v2598_v23, 0.0 }
0x134a   : > { %2600 = vadd.xlane.f32.xlu1 %v2599_v24 }
0x13d7   : > { %v2601_v49 = vpop.xlane.xlu1 %2600 }
0x13d8   : > { %v2602_v22 = vmul.f32 0.03125, %v2601_v49  ;;  %v3528_v49 = vld [vmem:[%s4182_s20] sm:$0xff]  }
0x13da   : > { %v2603_v27 = vadd.f32 1e-12, %v2602_v22  ;;  %v2980_v22 = vsel %vm697_vm0, %v3528_v49, 0 }
0x13dc   : > { %3576 = vrsqrt.f32 %v2603_v27  ;;  %v3529_v27 = vld [vmem:[%s4182_s20 + $0x8] sm:$0xff]  }
0x13e6   : > { %v3577_v28 = vpop.eup %3576 }
0x13e7   : > { %v2605_v30 = vmul.f32 %v3577_v28, %v2597_v21  ;;  %v2983_v28 = vsel %vm697_vm0, %v3529_v27, 0 }
0x13e9   : > { %v2612_v32 = vmul.f32 %v3182_v29, %v2605_v30  ;;  %v3530_v29 = vld [vmem:[%s4182_s20 + $0x10] sm:$0xff]  }
0x13ea   : > { %v2986_v30 = vsel %vm697_vm0, %v3530_v29, 0 }
0x13eb   : > { %v2619_v33 = vadd.f32 %v3183_v31, %v2612_v32  ;;  %v3531_v31 = vld [vmem:[%s4182_s20 + $0x18] sm:$0xff]  }
0x13ec   : > { %v2989_v32 = vsel %vm697_vm0, %v3531_v31, 0 }
0x13ed   : > { %v2627_v34 = vpack.c.bf16 %v2619_v33, %v2619_v33 }
0x13ef   : > { %3439 = vmatmul.mubr.msk.bf16.vlgmr.msra.gmra.mrb[16].mxu0 %vm697_vm0, %v2627_v34 }
0x13f0   : > { %3458 = vmatprep.mubr.msk.bf16.mxu0 %vm3595_vm1, %v3594_v8  ;;  %3455 = vmatpush3.bf16.msra.mxu0 %v3526_v0 }
0x13f1   : > { %3456 = vmatprep.subr.bf16.mxu0 %v3594_v8 }
0x13f4   : > { %3457 = vmatpush3.bf16.msra.mxu0 %v3527_v1 }
0x13f5   : > { %3462 = vmatprep.subr.bf16.mxu0 %v3594_v8 }
0x14c2   : > { %v2683_v40 = vpop.f32.mrb[16].mxu0 }
0x14c3   : > { %v2684_v41 = vadd.f32 %v3189_v39, %v2683_v40  ;;  %v3440_v42 = vpop.f32.mrb[17].mxu0  ;;  %v3533_v40 = vld [vmem:[%s4182_s20 + $0x28] sm:$0xff]  }
0x14c4   : > { %v2686_v43 = vpop.f32.mrb[18].mxu0  ;;  %v3534_v42 = vld [vmem:[%s4182_s20 + $0x30] sm:$0xff]  }
0x14c5   : > { %v2690_v44 = vmul.f32 0.70710677, %v2684_v41  ;;  %v3441_v45 = vpop.f32.mrb[19].mxu0  ;;  %v2689_v47 = vmul.f32 0.5, %v2684_v41  ;;  %v2995_v41 = vsel %vm697_vm0, %v3533_v40, 0  ;;  %v2998_v43 = vsel %vm697_vm0, %v3534_v42, 0 }
0x14c7   : > { %3578 = verf.f32 %v2690_v44  ;;  %v3535_v44 = vld [vmem:[%s4182_s20 + $0x38] sm:$0xff]  }
0x14c8   : > { %v3001_v45 = vsel %vm697_vm0, %v3535_v44, 0 }
0x14d1   : > { %v3579_v46 = vpop.eup %3578 }
0x14d2   : > { %v2692_v50 = vadd.f32 1.0, %v3579_v46 }
0x14d4   : > { %v2693_v51 = vmul.f32 %v2692_v50, %v2689_v47 }
0x14d6   : > { %v2705_v48 = vpack.c.bf16 %v2693_v51, %v2693_v51 }
0x14d8   : > { %3451 = vmatmul.mubr.msk.bf16.vlgmr.msra.gmra.mrb[40].mxu1 %vm1694_vm5, %v2705_v48  ;;  %v3216_v48 = vld [vmem:[%s4180_s18] ss:$0 sm:$0xff] }
0x15ab   : > { %v2773_v53 = vpop.f32.mrb[40].mxu1 }
0x15ac   : > { %v2774_v54 = vadd.f32 %v3202_v52, %v2773_v53  ;;  %v3452_v55 = vpop.f32.mrb[41].mxu1 }
0x15ad   : > { %v2776_v56 = vpop.f32.mrb[42].mxu1 }
0x15ae   : > { %v3453_v57 = vpop.f32.mrb[43].mxu1  ;;  %v2779_v58 = vadd.f32 %v2774_v54, %v2619_v33  ;;  %v3532_v33 = vld [vmem:[%s4182_s20 + $0x20] sm:$0xff]  }
0x15af   : > { %v2992_v34 = vsel %vm697_vm0, %v3532_v33, 0  ;;  %v3218_v56 = vld [vmem:[%s4183_s21] ss:$0 sm:$0xff] }
0x15b0   : > { %v2784_v59 = vsel %vm697_vm0, %v2779_v58, 0.0 }
0x15b1   : > { %2785 = vadd.xlane.f32.xlu0 %v2784_v59 }
0x163e   : > { %v2786_v60 = vpop.xlane.xlu0 %2785 }
0x163f   : > { %v2787_v18 = vmul.f32 0.03125, %v2786_v60 }
0x1641   : > { %v2788_v61 = vsub.f32 %v2779_v58, %v2787_v18 }
0x1643   : > { %v2789_v62 = vmul.f32 %v2788_v61, %v2788_v61 }
0x1645   : > { %v2790_v63 = vsel %vm697_vm0, %v2789_v62, 0.0 }
0x1646   : > { %2791 = vadd.xlane.f32.xlu0 %v2790_v63 }
0x16d3   : > { %v2792_v2 = vpop.xlane.xlu0 %2791 }
0x16d4   : > { %v2793_v3 = vmul.f32 0.03125, %v2792_v2 }
0x16d6   : > { %v2794_v4 = vadd.f32 1e-12, %v2793_v3 }
0x16d8   : > { %3580 = vrsqrt.f32 %v2794_v4 }
0x16e2   : > { %v3581_v5 = vpop.eup %3580 }
0x16e3   : > { %v2796_v7 = vmul.f32 %v3581_v5, %v2788_v61 }
0x16e5   : > { %v2803_v10 = vmul.f32 %v3210_v6, %v2796_v7 }
0x16e7   : > { %v2810_v11 = vadd.f32 %v3211_v9, %v2803_v10 }
0x16e9   : > { %v2816_v12 = vpack.c.bf16 %v2810_v11, %v2810_v11 }
0x16eb   : > { %3459 = vmatmul.mubr.msk.bf16.vlgmr.msra.gmra.mrb[20].mxu0 %vm697_vm0, %v2816_v12 }
0x16ec   : > { %3478 = vmatprep.mubr.msk.bf16.mxu0 %vm3595_vm1, %v3594_v8  ;;  %3463 = vmatpush3.bf16.xpose.msra.mxu0 %v2980_v22 }
0x16ed   : > { %3464 = vmatprep.subr.bf16.mxu0 %v3594_v8 }
0x16f4   : > { %3465 = vmatpush3.bf16.xpose.msra.mxu0 %v2983_v28 }
0x16f5   : > { %3466 = vmatprep.subr.bf16.mxu0 %v3594_v8 }
0x16fc   : > { %3467 = vmatpush3.bf16.xpose.msra.mxu0 %v2986_v30 }
0x16fd   : > { %3468 = vmatprep.subr.bf16.mxu0 %v3594_v8 }
0x1704   : > { %3469 = vmatpush3.bf16.xpose.msra.mxu0 %v2989_v32 }
0x1705   : > { %3470 = vmatprep.subr.bf16.mxu0 %v3594_v8 }
0x170c   : > { %3471 = vmatpush3.bf16.xpose.msra.mxu0 %v2992_v34 }
0x170d   : > { %3472 = vmatprep.subr.bf16.mxu0 %v3594_v8 }
0x1714   : > { %3473 = vmatpush3.bf16.xpose.msra.mxu0 %v2995_v41 }
0x1715   : > { %3474 = vmatprep.subr.bf16.mxu0 %v3594_v8 }
0x171c   : > { %3475 = vmatpush3.bf16.xpose.msra.mxu0 %v2998_v43 }
0x171d   : > { %3476 = vmatprep.subr.bf16.mxu0 %v3594_v8  ;;  %v3217_v8 = vld [vmem:[%s4181_s19] ss:$0 sm:$0xff] }
0x1724   : > { %3477 = vmatpush3.bf16.xpose.msra.mxu0 %v3001_v45 }
0x17be   : > { %v2872_v14 = vpop.f32.mrb[20].mxu0 }
0x17bf   : > { %v2873_v15 = vadd.f32 %v3212_v13, %v2872_v14  ;;  %v3460_v16 = vpop.f32.mrb[21].mxu0 }
0x17c0   : > { %v2875_v17 = vpop.f32.mrb[22].mxu0 }
0x17c1   : > { %v2879_v19 = vmul.f32 0.70710677, %v2873_v15  ;;  %v3461_v20 = vpop.f32.mrb[23].mxu0  ;;  %v2878_v23 = vmul.f32 0.5, %v2873_v15 }
0x17c3   : > { %3582 = verf.f32 %v2879_v19 }
0x17cd   : > { %v3583_v21 = vpop.eup %3582 }
0x17ce   : > { %v2881_v24 = vadd.f32 1.0, %v3583_v21 }
0x17d0   : > { %v2882_v25 = vmul.f32 %v2881_v24, %v2878_v23 }
0x17d2   : > { %v2885_v26 = vsel %vm697_vm0, %v2882_v25, 0.0 }
0x17d3   : > { %2886 = vadd.xlane.f32.xlu0 %v2885_v26 }
0x1860   : > { %v2887_v35 = vpop.xlane.xlu0 %2886 }
0x1861   : > { %v2888_v36 = vmul.f32 0.03125, %v2887_v35 }
0x1863   : > { %v2889_v37 = vsub.f32 %v2882_v25, %v2888_v36 }
0x1865   : > { %v2890_v38 = vmul.f32 %v2889_v37, %v2889_v37 }
0x1867   : > { %v2891_v39 = vsel %vm697_vm0, %v2890_v38, 0.0 }
0x1868   : > { %2892 = vadd.xlane.f32.xlu1 %v2891_v39 }
0x18f5   : > { %v2893_v46 = vpop.xlane.xlu1 %2892 }
0x18f6   : > { %v2894_v47 = vmul.f32 0.03125, %v2893_v46 }
0x18f8   : > { %v2895_v50 = vadd.f32 1e-12, %v2894_v47 }
0x18fa   : > { %3584 = vrsqrt.f32 %v2895_v50 }
0x1904   : > { %v3585_v51 = vpop.eup %3584 }
0x1905   : > { %v2897_v52 = vmul.f32 %v3585_v51, %v2889_v37 }
0x1907   : > { %v2904_v53 = vmul.f32 %v3216_v48, %v2897_v52 }
0x1909   : > { %v2911_v54 = vadd.f32 %v3217_v8, %v2904_v53 }
0x190b   : > { %v2912_v55 = vpack.c.bf16 %v2911_v54, %v2911_v54 }
0x190d   : > { %3479 = vmatmul.mubr.msk.bf16.vlgmr.msra.gmra.mrb[24].mxu0 %vm697_vm0, %v2912_v55 }
0x19e0   : > { %v3037_v57 = vpop.f32.mrb[24].mxu0 }
0x19e1   : > { %v3038_v58 = vadd.f32 %v3218_v56, %v3037_v57  ;;  %v3480_v59 = vpop.f32.mrb[25].mxu0 }
0x19e2   : > { %v3040_v60 = vpop.f32.mrb[26].mxu0 }
0x19e3   : > { %3043 = vst [vmem:[%s692_s1] sm:$0xff] %v3038_v58  ;;  %v3481_v18 = vpop.f32.mrb[27].mxu0 }
0x19e4 PF: > { %s32_s3 = sadd.s32 1, %s3592_s3  }
0x19e5   : > { %p29_p4 = scmp.ge.s32.totalorder %s32_s3, 4  }
0x19e7   :  { %31 = sbr.rel (!%p29_p4) target bundleno = 8 (0x8), region = 153 }

</bundles_post_ra>
